<compile_context>
chip_gen: v7x
topology: tpu7x:2x2x1
jax: 0.10.0
libtpu: 0.0.40
codegen_flags: <defaults>
</compile_context>

<pallas_src>
import functools

import jax
import jax.numpy as jnp
import numpy as np
from jax.experimental import pallas as pl
from jax.experimental.pallas import tpu as pltpu


def _aligner_kernel(blk_a_ref, blk_b_ref, idx_ref, units_a_ref, units_b_ref,
                    out_ref, *, t_units):
    """One output tile: out[i, :] = units[idx[i], :] via a one-hot MXU matmul.

    blk_a_ref, blk_b_ref : SMEM (num_tiles,) int32 (scalar prefetch) -- block
                           indices (units of WBLK rows) of the two consecutive
                           source windows covering this tile's index range.
    idx_ref              : VMEM (TM, 1) int32 -- global gather indices.
    units_a/b_ref        : VMEM (WBLK, D)     -- source row windows.
    out_ref              : VMEM (TM, D).
    """
    t = pl.program_id(0)
    wblk, _ = units_a_ref.shape
    tm = out_ref.shape[0]

    base_a = blk_a_ref[t] * wblk
    base_b = blk_b_ref[t] * wblk
    off_b = base_b - base_a                      # 0 (clamped last block) or wblk

    # Edge blocks may overhang T_units; padded rows are undefined, so mask them
    # with a select *before* the matmul (0 * NaN would poison the one-hot dot).
    row = jax.lax.broadcasted_iota(jnp.int32, (wblk, 1), 0)
    win_a = jnp.where(row < (t_units - base_a), units_a_ref[...], 0)
    win_b = jnp.where(row < (t_units - base_b), units_b_ref[...], 0)

    lidx = idx_ref[...] - base_a                 # (TM, 1), values in [0, 2*WBLK)
    col = jax.lax.broadcasted_iota(jnp.int32, (tm, wblk), 1)
    p_a = (lidx == col).astype(win_a.dtype)
    p_b = jnp.logical_and(lidx - off_b == col, off_b > 0).astype(win_b.dtype)

    acc = jnp.dot(p_a, win_a, preferred_element_type=jnp.float32)
    acc = acc + jnp.dot(p_b, win_b, preferred_element_type=jnp.float32)
    out_ref[...] = acc.astype(out_ref.dtype)


def units_aligner(units, n_frames, *, hop_size=512, sample_rate=44100,
                  encoder_hop_size=320, encoder_sample_rate=16000,
                  tile_m=256, min_pallas_elems=64 * 1024):
    """JAX/Pallas equivalent of UnitsAligner.forward.

    units    : (B, T_units, D) float array.  Like torch.gather with a batch-1
               index, only batch 0 is read; the output batch dim is always 1.
    n_frames : static int number of output frames.
    returns  : (1, n_frames, D)
    """
    assert units.ndim == 3
    _, t_units, d = units.shape
    ratio = (hop_size / sample_rate) / (encoder_hop_size / encoder_sample_rate)

    # torch multiplies a python float by an int tensor -> float32, then rounds
    # half-to-even; replicate in f32 on the host (the schedule is fully static).
    idx = np.minimum(
        np.round(np.float32(ratio) *
                 np.arange(n_frames, dtype=np.float32)).astype(np.int32),
        t_units - 1)

    # Tiny problems: pallas_call fixed cost dominates -> plain XLA gather.
    if n_frames * d < min_pallas_elems:
        return jnp.take(units[0], jnp.asarray(idx), axis=0)[None]

    # ---- host-side static tiling of the (monotone) index schedule ----------
    num_tiles = pl.cdiv(n_frames, tile_m)
    n_pad = num_tiles * tile_m
    idx_pad = np.full((n_pad,), t_units - 1, dtype=np.int32)
    idx_pad[:n_frames] = idx

    tiles = idx_pad.reshape(num_tiles, tile_m)
    lo = tiles.min(axis=1)
    hi = tiles.max(axis=1)
    span = int((hi - lo).max()) + 1
    wblk = max(8, -(-span // 8) * 8)             # window height, multiple of 8
    n_blocks = -(-t_units // wblk)
    blk_a = (lo // wblk).astype(np.int32)
    blk_b = np.minimum(blk_a + 1, n_blocks - 1).astype(np.int32)
    assert np.all(hi < (blk_a + 2) * wblk), "source window too small"

    itemsize = np.dtype(units.dtype).itemsize
    cost = pl.CostEstimate(
        flops=int(4 * num_tiles * tile_m * wblk * d),
        transcendentals=0,
        bytes_accessed=int((n_pad * d + 2 * num_tiles * wblk * d) * itemsize
                           + n_pad * 4),
    )

    kernel = functools.partial(_aligner_kernel, t_units=t_units)
    out2d = pl.pallas_call(
        kernel,
        out_shape=jax.ShapeDtypeStruct((n_pad, d), units.dtype),
        grid_spec=pltpu.PrefetchScalarGridSpec(
            num_scalar_prefetch=2,
            grid=(num_tiles,),
            in_specs=[
                pl.BlockSpec((tile_m, 1), lambda t, a, b: (t, 0)),
                pl.BlockSpec((None, wblk, d), lambda t, a, b: (0, a[t], 0)),
                pl.BlockSpec((None, wblk, d), lambda t, a, b: (0, b[t], 0)),
            ],
            out_specs=pl.BlockSpec((tile_m, d), lambda t, a, b: (t, 0)),
        ),
        compiler_params=pltpu.CompilerParams(
            dimension_semantics=("parallel",)),
        cost_estimate=cost,
    )(jnp.asarray(blk_a), jnp.asarray(blk_b),
      jnp.asarray(idx_pad).reshape(n_pad, 1), units, units)

    return out2d[:n_frames][None]


def _reference(units, n_frames, *, hop_size=512, sample_rate=44100,
               encoder_hop_size=320, encoder_sample_rate=16000):
    """Pure-JAX reference mirroring the PyTorch forward."""
    ratio = (hop_size / sample_rate) / (encoder_hop_size / encoder_sample_rate)
    t_units = units.shape[1]
    index = jnp.minimum(
        jnp.round(jnp.float32(ratio) *
                  jnp.arange(n_frames, dtype=jnp.float32)).astype(jnp.int32),
        t_units - 1)
    return jnp.take(units[0], index, axis=0)[None]


if __name__ == "__main__":
    key = jax.random.PRNGKey(0)
    # Small-but-real shapes: batch=1, T_units=400 encoder frames, D=128
    # (lane-dense), n_frames=700 output frames -> 3 tiles of 256; exercises
    # index clamping, output-row padding and the partial edge source block.
    B, T_UNITS, D = 1, 400, 128
    N_FRAMES = 700

    units = jax.random.normal(key, (B, T_UNITS, D), dtype=jnp.float32)

    out = units_aligner(units, N_FRAMES)
    out = jax.block_until_ready(out)
    ref = _reference(units, N_FRAMES)
    assert out.shape == (1, N_FRAMES, D), out.shape
    assert jnp.allclose(out, ref), "Pallas gather mismatch vs reference"

    # Tiny-shape path (dispatches to plain jnp.take; no Pallas overhead).
    small = jax.random.normal(key, (1, 8, 32), dtype=jnp.float32)
    out_small = jax.block_until_ready(units_aligner(small, 12))
    assert jnp.allclose(out_small, _reference(small, 12))

    print("KERNEL_OK")
</pallas_src>

<mosaic_0001>
module attributes {stable_mosaic.version = 11 : i64} {
  func.func @_aligner_kernel(%arg0: i32, %arg1: memref<3xi32, #tpu.memory_space<smem>>, %arg2: memref<3xi32, #tpu.memory_space<smem>>, %arg3: memref<256x1xi32, #tpu.memory_space<vmem>>, %arg4: memref<1x152x128xf32, #tpu.memory_space<vmem>>, %arg5: memref<1x152x128xf32, #tpu.memory_space<vmem>>, %arg6: memref<256x128xf32, #tpu.memory_space<vmem>>) attributes {dimension_semantics = [#tpu.dimension_semantics<parallel>], iteration_bounds = array<i64: 3>, scalar_prefetch = 2 : i64, scratch_operands = 0 : i64, tpu.core_type = #tpu.core_type<tc>, window_params = [{transform_indices = @transform_0, window_bounds = array<i64: 256, 1>}, {transform_indices = @transform_1, window_bounds = array<i64: 1, 152, 128>}, {transform_indices = @transform_2, window_bounds = array<i64: 1, 152, 128>}, {transform_indices = @transform_3, window_bounds = array<i64: 256, 128>}]} {
    %0 = arith.index_cast %arg0 : i32 to index
    %1 = memref.load %arg1[%0] : memref<3xi32, #tpu.memory_space<smem>>
    %c152_i32 = arith.constant 152 : i32
    %2 = arith.muli %1, %c152_i32 : i32
    %3 = arith.index_cast %arg0 : i32 to index
    %4 = memref.load %arg2[%3] : memref<3xi32, #tpu.memory_space<smem>>
    %c152_i32_0 = arith.constant 152 : i32
    %5 = arith.muli %4, %c152_i32_0 : i32
    %6 = arith.subi %5, %2 : i32
    %7 = tpu.iota {dimensions = array<i32: 0>} : vector<152x1xi32>
    %c400_i32 = arith.constant 400 : i32
    %8 = arith.subi %c400_i32, %2 : i32
    %9 = vector.broadcast %8 : i32 to vector<152x1xi32>
    %10 = arith.cmpi slt, %7, %9 : vector<152x1xi32>
    %c0 = arith.constant 0 : index
    %c0_1 = arith.constant 0 : index
    %c0_2 = arith.constant 0 : index
    %11 = vector.load %arg4[%c0, %c0_1, %c0_2] : memref<1x152x128xf32, #tpu.memory_space<vmem>>, vector<1x152x128xf32>
    %12 = vector.shape_cast %11 : vector<1x152x128xf32> to vector<152x128xf32>
    %c0_i32 = arith.constant 0 : i32
    %13 = arith.sitofp %c0_i32 : i32 to f32
    %14 = vector.shape_cast %10 : vector<152x1xi1> to vector<152x1xi1>
    %15 = vector.broadcast %14 : vector<152x1xi1> to vector<152x128xi1>
    %16 = vector.broadcast %13 : f32 to vector<152x128xf32>
    %17 = arith.select %15, %12, %16 : vector<152x128xi1>, vector<152x128xf32>
    %c400_i32_3 = arith.constant 400 : i32
    %18 = arith.subi %c400_i32_3, %5 : i32
    %19 = vector.broadcast %18 : i32 to vector<152x1xi32>
    %20 = arith.cmpi slt, %7, %19 : vector<152x1xi32>
    %c0_4 = arith.constant 0 : index
    %c0_5 = arith.constant 0 : index
    %c0_6 = arith.constant 0 : index
    %21 = vector.load %arg5[%c0_4, %c0_5, %c0_6] : memref<1x152x128xf32, #tpu.memory_space<vmem>>, vector<1x152x128xf32>
    %22 = vector.shape_cast %21 : vector<1x152x128xf32> to vector<152x128xf32>
    %c0_i32_7 = arith.constant 0 : i32
    %23 = arith.sitofp %c0_i32_7 : i32 to f32
    %24 = vector.shape_cast %20 : vector<152x1xi1> to vector<152x1xi1>
    %25 = vector.broadcast %24 : vector<152x1xi1> to vector<152x128xi1>
    %26 = vector.broadcast %23 : f32 to vector<152x128xf32>
    %27 = arith.select %25, %22, %26 : vector<152x128xi1>, vector<152x128xf32>
    %c0_8 = arith.constant 0 : index
    %c0_9 = arith.constant 0 : index
    %28 = vector.load %arg3[%c0_8, %c0_9] : memref<256x1xi32, #tpu.memory_space<vmem>>, vector<256x1xi32>
    %29 = vector.broadcast %2 : i32 to vector<256x1xi32>
    %30 = arith.subi %28, %29 : vector<256x1xi32>
    %31 = tpu.iota {dimensions = array<i32: 1>} : vector<256x152xi32>
    %32 = vector.broadcast %30 : vector<256x1xi32> to vector<256x152xi32>
    %33 = arith.cmpi eq, %32, %31 : vector<256x152xi32>
    %34 = arith.extui %33 : vector<256x152xi1> to vector<256x152xi32>
    %35 = arith.sitofp %34 : vector<256x152xi32> to vector<256x152xf32>
    %36 = vector.broadcast %6 : i32 to vector<256x1xi32>
    %37 = arith.subi %30, %36 : vector<256x1xi32>
    %38 = vector.broadcast %37 : vector<256x1xi32> to vector<256x152xi32>
    %39 = arith.cmpi eq, %38, %31 : vector<256x152xi32>
    %c0_i32_10 = arith.constant 0 : i32
    %40 = arith.cmpi sgt, %6, %c0_i32_10 : i32
    %41 = vector.broadcast %40 : i1 to vector<256x152xi1>
    %42 = arith.andi %39, %41 : vector<256x152xi1>
    %43 = arith.extui %42 : vector<256x152xi1> to vector<256x152xi32>
    %44 = arith.sitofp %43 : vector<256x152xi32> to vector<256x152xf32>
    %cst = arith.constant dense<0.000000e+00> : vector<256x128xf32>
    %45 = tpu.matmul %35, %17, %cst {dimension_numbers = #tpu.dot_dimension_numbers<[1], [0], [0], [1], [0, 0, 1, 1], [], []>} : vector<256x152xf32>, vector<152x128xf32>, vector<256x128xf32> -> vector<256x128xf32>
    %cst_11 = arith.constant dense<0.000000e+00> : vector<256x128xf32>
    %46 = tpu.matmul %44, %27, %cst_11 {dimension_numbers = #tpu.dot_dimension_numbers<[1], [0], [0], [1], [0, 0, 1, 1], [], []>} : vector<256x152xf32>, vector<152x128xf32>, vector<256x128xf32> -> vector<256x128xf32>
    %47 = arith.addf %45, %46 : vector<256x128xf32>
    %c0_12 = arith.constant 0 : index
    %c0_13 = arith.constant 0 : index
    %48 = vector.load %arg6[%c0_12, %c0_13] : memref<256x128xf32, #tpu.memory_space<vmem>>, vector<256x128xf32>
    tpu.vector_store %arg6[%c0_12, %c0_13], %47 {strides = array<i32>} : memref<256x128xf32, #tpu.memory_space<vmem>>, vector<256x128xf32>,
    return
  }
  func.func @transform_0(%arg0: i32, %arg1: memref<3xi32, #tpu.memory_space<smem>>, %arg2: memref<3xi32, #tpu.memory_space<smem>>) -> (i32, i32) {
    %c0_i32 = arith.constant 0 : i32
    %c0_i32_0 = arith.constant 0 : i32
    return %arg0, %c0_i32 : i32, i32
  }
  func.func @transform_1(%arg0: i32, %arg1: memref<3xi32, #tpu.memory_space<smem>>, %arg2: memref<3xi32, #tpu.memory_space<smem>>) -> (i32, i32, i32) {
    %0 = arith.index_cast %arg0 : i32 to index
    %1 = memref.load %arg1[%0] : memref<3xi32, #tpu.memory_space<smem>>
    %c0_i32 = arith.constant 0 : i32
    %c0_i32_0 = arith.constant 0 : i32
    %c0_i32_1 = arith.constant 0 : i32
    return %c0_i32, %1, %c0_i32_0 : i32, i32, i32
  }
  func.func @transform_2(%arg0: i32, %arg1: memref<3xi32, #tpu.memory_space<smem>>, %arg2: memref<3xi32, #tpu.memory_space<smem>>) -> (i32, i32, i32) {
    %0 = arith.index_cast %arg0 : i32 to index
    %1 = memref.load %arg2[%0] : memref<3xi32, #tpu.memory_space<smem>>
    %c0_i32 = arith.constant 0 : i32
    %c0_i32_0 = arith.constant 0 : i32
    %c0_i32_1 = arith.constant 0 : i32
    return %c0_i32, %1, %c0_i32_0 : i32, i32, i32
  }
  func.func @transform_3(%arg0: i32, %arg1: memref<3xi32, #tpu.memory_space<smem>>, %arg2: memref<3xi32, #tpu.memory_space<smem>>) -> (i32, i32) {
    %c0_i32 = arith.constant 0 : i32
    %c0_i32_0 = arith.constant 0 : i32
    return %arg0, %c0_i32 : i32, i32
  }
}

</mosaic_0001>

<bundles_post_ra>
// kernel: tpu_custom_call.1
= control target key start
LH: loop header
LB: loop body
LE: loop exit
PB: predicated region body
PF: predicated region fallthrough
CT: control target
= control target key end

     0   :  { %s3940_s0 = inlined_call_operand.vmem [shape: s32[3], index: 0, kind: input, shape index: {}]   ;;  %s3941_s2 = inlined_call_operand.vmem [shape: s32[768,1], index: 2, kind: input, shape index: {}]   ;;  %s3942_s3 = inlined_call_operand.vmem [shape: f32[1,400,128], index: 3, kind: input, shape index: {}]   ;;  %s3943_s4 = inlined_call_operand.hbm [shape: f32[1,400,128], index: 4, kind: input, shape index: {}]   ;;  %s3944_s5 = inlined_call_operand.hbm [shape: f32[768,128], index: 5, kind: output, shape index: {}]   ;;  %s3945_s1 = inlined_call_operand.vmem [shape: s32[3], index: 1, kind: input, shape index: {}]  }
   0x1   :  { %s10_s20 = sshll.u32 %s3940_s0, 4  ;;  %s14_s23 = sshll.u32 %s3945_s1, 4  ;;  %s11_s20 = int_to_ptr.vmem [resolvable:$true] %s10_s20  ;;  %s15_s23 = int_to_ptr.vmem [resolvable:$true] %s14_s23 }
   0x2   :  { %s2534_s24 = scalar_lea.vmem %s11_s20, 16  ;;  %p2539_p1 = scmp.lt.s32.totalorder %s11_s20, %s11_s20 }
   0x3   :  { %p2535_p0 = scmp.ne.s32.totalorder %s11_s20, %s2534_s24  ;;  %p2540_p2 = scmp.lt.s32.totalorder %s2534_s24, %s2534_s24 }
   0x5   :  { %p2541_p3 = por %p2540_p2, %p2539_p1 }
   0x7   :  { %p2542_p4 = pnand %p2541_p3, %p2535_p0 }
   0x9   :  { %2545 = shalt.err (!%p2542_p4)  }
   0xa   :  { %s2680_s25 = smov [#allocation3]   ;;  %s2546_s26 = scalar_lea.vmem %s15_s23, 16 }
   0xb   :  { %13 = dma.vmem_to_smem %s11_s20, 16, %s2680_s25, [#allocation2] }
   0xc   :  { %p2547_p5 = scmp.ne.s32.totalorder %s15_s23, %s2546_s26  ;;  %p2551_p6 = scmp.lt.s32.totalorder %s15_s23, %s15_s23 }
   0xd   :  { %p2552_p7 = scmp.lt.s32.totalorder %s2546_s26, %s2546_s26 }
   0xf   :  { %p2553_p8 = por %p2552_p7, %p2551_p6 }
  0x11   :  { %p2554_p9 = pnand %p2553_p8, %p2547_p5 }
  0x13   :  { %2557 = shalt.err (!%p2554_p9)  }
  0x14   :  { %s2681_s0 = smov [#allocation4]  }
  0x15   :  { %17 = dma.vmem_to_smem %s15_s23, 16, %s2681_s0, [#allocation2] }
  0x16   :  { %2642 = dma.done.wait [#allocation2], 32 }
  0x17   :  { %2643 = vsyncadd [#allocation2], 4294967264 }
  0x18   :  { %19 = sfence }
  0x19   :  { %20 = vsyncpa [#allocation6], 0 }
  0x1a   :  { %22 = vsyncpa [#allocation6 + $0x1], 0 }
  0x1b   :  { %23 = vsyncpa [#allocation7], 0 }
  0x1c   :  { %25 = vsyncpa [#allocation7 + $0x1], 0  ;;  %s2728_s1 = smov 0   ;;  %s2730_s27 = smov 0  }
  0x1d   :  { %s2732_s28 = smov 0   ;;  %s2734_s29 = smov 0  }
  0x1e   :  { %s2736_s30 = smov 0   ;;  %s2738_s6 = smov 0  }
  0x1f   :  { %s2740_s7 = smov 0  }
  0x20 LB: > { %s2762_s8 = sadd.s32 4294967295, %s2678_s7   ;;  %s2038_s9 = sadd.s32 4294967294, %s2678_s7   ;;  %s2678_s7 = sphi %s2740_s7, %s3981_s7   ;;  %s2674_s6 = sphi %s2738_s6, %s3980_s6   ;;  %s2670_s30 = sphi %s2736_s30, %s3979_s30   ;;  %s2666_s29 = sphi %s2734_s29, %s3978_s29   ;;  %s2662_s28 = sphi %s2732_s28, %s3977_s28   ;;  %s2658_s27 = sphi %s2730_s27, %s3976_s27   ;;  %s2654_s1 = sphi %s2728_s1, %s3975_s1  }
  0x21   : > { %s2766_s10 = sadd.s32 1, %s2678_s7   ;;  %s89_s11 = sld [smem:[#allocation4 + %s2678_s7]] }
  0x22   : > { %s90_s12 = sld [smem:[#allocation4 + %s2766_s10]]  ;;  %s94_s13 = sadd.s32 1, %s2674_s6 }
  0x23   : > { %p101_p10 = scmp.ne.s32.totalorder %s2674_s6, %s2670_s30  ;;  %p102_p11 = scmp.eq.s32.totalorder %s2678_s7, 0 }
  0x24   : > { %p107_p12 = scmp.ne.s32.totalorder %s2670_s30, %s2666_s29  ;;  %p108_p13 = scmp.eq.s32.totalorder %s2762_s8, 0 }
  0x25   : > { %p2776_p0 = por %p102_p11, %p101_p10  ;;  %s117_s15 = ssub.s32 %s2678_s7, %s2766_s10 }
  0x26   : > { %p2782_p1 = por %p108_p13, %p107_p12  ;;  %p118_p2 = scmp.eq.s32.totalorder %s117_s15, 0 }
  0x27   : > { %s120_s17 = sadd.s32 1, %s2662_s28  ;;  %p130_p3 = scmp.ne.s32.totalorder %s2662_s28, %s2658_s27 }
  0x28   : > { %s91_s18 = ssub.s32 %s89_s11, %s90_s12  ;;  %p131_p4 = scmp.eq.s32.totalorder %s2762_s8, 2 }
  0x29   : > { %p92_p5 = scmp.eq.s32.totalorder %s91_s18, 0  ;;  %p136_p6 = scmp.ne.s32.totalorder %s2658_s27, %s2654_s1 }
  0x2a   : > { %s2793_s19 = scalar_select %p118_p2, %s2662_s28, %s120_s17  }
  0x2b   : > { %s2796_s20 = scalar_select %p92_p5, %s2674_s6, %s94_s13  }
  0x2c   : > { %p2798_p7 = por %p131_p4, %p130_p3  ;;  %p137_p8 = scmp.eq.s32.totalorder %s2038_s9, 2 }
  0x2d   : > { %p2040_p10 = scmp.ge.s32.totalorder %s2678_s7, 3 }
  0x2e   : > { %p2802_p9 = por %p137_p8, %p136_p6 }
  0x2f   : > { %153 = sbr.rel (%p2040_p10) target bundleno = 94 (0x5e), region = 16 }
  0x30   : > { %s3949_s22 = scalar_select %p2802_p9, 1, 0 }
  0x36   : > { %184 = sbr.rel (!%p2776_p0) target bundleno = 94 (0x5e), region = 28  ;;  %s185_s23 = sand.u32 (%p2776_p0), 1, %s2674_s6  }
  0x37   : > { %s190_s24 = sld [smem:[#allocation4 + %s2678_s7]] (%p2776_p0)  ;;  %s2456_s25 = smul.u32 (%p2776_p0), 152, %s185_s23 }
  0x38   : > { %s2814_s11 = scalar_lea.sflag (%p2776_p0), [#allocation6], %s185_s23 }
  0x39   : > { %s189_s12 = scalar_lea.vmem (%p2776_p0), [#allocation5], %s2456_s25 }
  0x3d   : > { %s191_s26 = smul.u32 19, %s190_s24 }
  0x3f   : > { %s192_s0 = ssub.s32 50, %s191_s26 }
  0x40   : > { %p193_p11 = scmp.lt.s32.totalorder %s192_s0, 19 }
  0x42   : > { %s3983_s0 = smov (!%p193_p11, %s192_s0), 19 }
  0x43   : > { %s2811_s29 = sshll.u32 %s3983_s0, 7 }
  0x44   : > { %s197_s9 = ssub.s32 2432, %s2811_s29 }
  0x45   : > { %198 = vsyncadd %s2814_s11, %s197_s9  ;;  %p2042_p12 = scmp.ne.s32.totalorder %s2811_s29, 0  ;;  %s2350_s13 = smul.u32 2432, %s190_s24 }
  0x46   : > { %s203_s14 = sshll.u32 %s189_s12, 4  ;;  %s2562_s24 = scalar_lea.hbm %s3943_s4, 6400  ;;  %s2823_s14 = int_to_ptr.vmem [resolvable:$true] %s203_s14 }
  0x47   : > { %s2821_s18 = scalar_lea.hbm %s3943_s4, %s2350_s13 }
  0x48   : > { %s2558_s23 = scalar_lea.hbm %s2821_s18, %s2811_s29  ;;  %p2563_p3 = scmp.lt.u32.totalorder %s2821_s18, %s3943_s4 }
  0x49   : > { %p2559_p13 = scmp.ne.s32.totalorder %s2821_s18, %s2558_s23  ;;  %p2564_p4 = scmp.lt.u32.totalorder %s2562_s24, %s2558_s23 }
  0x4a   : > { %p2566_p6 = scmp.lt.u32.totalorder %s2558_s23, %s2821_s18 }
  0x4b   : > { %p2560_p0 = pnand %p2559_p13, %p2042_p12  ;;  %p2565_p5 = por %p2564_p4, %p2563_p3 }
  0x4d   : > { %p2561_p2 = pneg %p2560_p0  ;;  %p2567_p8 = por %p2566_p6, %p2565_p5 }
  0x4f   : > { %p2568_p10 = pnand %p2567_p8, %p2561_p2 }
  0x51   : > { %2571 = shalt.err (!%p2568_p10)
}
  0x52   : > { %s2572_s12 = scalar_lea.vmem %s2823_s14, %s2811_s29  ;;  %s2682_s13 = smov [#allocation5]  }
  0x53   : > { %p2573_p11 = scmp.ne.s32.totalorder %s2823_s14, %s2572_s12  ;;  %s2576_s15 = sshll.u32 %s2682_s13, 4  ;;  %s2577_s15 = int_to_ptr.vmem [resolvable:$false] %s2576_s15 }
  0x54   : > { %s2578_s17 = scalar_lea.vmem %s2577_s15, 4864  ;;  %p2579_p9 = scmp.lt.s32.totalorder %s2823_s14, %s2577_s15 }
  0x55   : > { %p2574_p13 = pnand %p2573_p11, %p2042_p12  ;;  %p2580_p3 = scmp.lt.s32.totalorder %s2578_s17, %s2572_s12 }
  0x57   : > { %p2575_p0 = pneg %p2574_p13  ;;  %p2581_p4 = por %p2580_p3, %p2579_p9 }
  0x59   : > { %p2582_p5 = pnand %p2581_p4, %p2575_p0 }
  0x5b   : > { %2585 = shalt.err (!%p2582_p5)
}
  0x5c   : > { %s2683_s23 = smov 128   ;;  %s2684_s25 = smov 8  }
  0x5d   : > { %209 = dma.hbm_to_vmem [thread:$0]  (%p2042_p12), %s2821_s18, %s2811_s29, %s2823_s14, %s2814_s11, %s2683_s23, %s2683_s23, %s2684_s25  }
  0x5e PF: > { %p2046_p2 = scmp.ge.s32.totalorder %s2678_s7, 1  ;;  %p211_p6 = scmp.lt.s32.totalorder %s2678_s7, 4 }
  0x60   : > { %p212_p8 = pnand %p2046_p2, %p211_p6 }
  0x61   : > { %s217_s26 = sand.u32 (!%p212_p8), 1, %s2670_s30  }
  0x62   : > { %215 = sbr.rel (%p212_p8) target bundleno = 607 (0x25f), region = 32  ;;  %s218_s0 = scalar_lea.sflag (!%p212_p8), [#allocation6], %s217_s26 }
  0x63   : > { %s2457_s24 = smul.u32 (!%p212_p8), 152, %s217_s26 }
  0x65   : > { %s2853_s9 = scalar_lea.vmem (!%p212_p8), [#allocation5], %s2457_s24 }
  0x69   : > { %2645 = dma.done.wait (%p2782_p1), %s218_s0, 2432  }
  0x6a   : > { %2647 = vsyncadd (%p2782_p1), %s218_s0, 4294964864  ;;  %s2048_s29 = sshll.u32 %s2762_s8, 5  ;;  %v2685_v0 = vmov 0   ;;  %s288_s11 = sld [smem:[#allocation3 + %s2762_s8]]  ;;  %v2686_v1 = vmov 0.0|0.0   ;;  %v293_v4 = vlaneseq  ;;  %v431_v43 = vld [vmem:[%s2853_s9] sm:$0xff] }
  0x6b   : > { %2533 = vset.pattern.permute.xlu1 %v2685_v0  ;;  %2532 = vset.pattern.permute.xlu0 %v2685_v0  ;;  %p260_p9 = scmp.lt.s32.totalorder %s2048_s29, 95  ;;  %s2862_s14 = sld [smem:[#allocation4 + %s2762_s8]]  ;;  %v432_v44 = vld [vmem:[%s2853_s9 + $0x8] sm:$0xff]  ;;  %v433_v51 = vld [vmem:[%s2853_s9 + $0x10] sm:$0xff]  ;;  %v434_v56 = vld [vmem:[%s2853_s9 + $0x18] sm:$0xff] }
  0x6c   : > { %2352 = vmatprep.subr.bf16.mxu1 %v2686_v1  ;;  %2388 = vmatprep.subr.bf16.mxu0 %v2686_v1  ;;  %s265_s16 = sld [smem:[#allocation3 + %s2762_s8]]  ;;  %v2894_v14 = vshrl.u32 %v293_v4, 7  ;;  %v2353_v60 = vpack.c.bf16 %v432_v44, %v431_v43 }
  0x6d   : > { %s3985_s29 = smov (!%p260_p9, %s2048_s29), 95 }
  0x6e   : > { %s2049_s18 = sshll.u32 %s3985_s29, 3  ;;  %v295_v23 = vadd.s32 8, %v2894_v14  ;;  %v2919_v27 = vadd.s32 16, %v2894_v14  ;;  %v2922_v28 = vadd.s32 24, %v2894_v14  ;;  %v2935_v34 = vadd.s32 32, %v2894_v14 }
  0x6f   : > { %s2870_s15 = scalar_lea.vmem %s3941_s2, %s2049_s18  ;;  %v2987_v57 = vadd.s32 40, %v2894_v14  ;;  %s256_s18 = sand.u32 1, %s2658_s27  }
  0x70   : > { %s2872_s17 = smul.u32 152, %s288_s11  ;;  %v508_v2 = vld [vmem:[%s2870_s15 + $0x8] sm:$0xff]  ;;  %v507_v3 = vld [vmem:[%s2870_s15] sm:$0xff]  ;;  %v509_v8 = vld [vmem:[%s2870_s15 + $0x10] sm:$0xff]  ;;  %s2047_s12 = sshll.u32 %s256_s18, 8 }
  0x71   : > { %s291_s23 = smul.u32 152, %s2862_s14  ;;  %v510_v10 = vld [vmem:[%s2870_s15 + $0x18] sm:$0xff]  ;;  %v511_v13 = vld [vmem:[%s2870_s15 + $0x20] sm:$0xff]  ;;  %v512_v17 = vld [vmem:[%s2870_s15 + $0x28] sm:$0xff]  ;;  %s3845_s13 = scalar_lea.vmem [#allocation8], %s2047_s12 }
  0x72   : > { %v2878_v5 = vstv %s2872_s17  ;;  %s266_s25 = smul.u32 19, %s265_s16  ;;  %v523_v19 = vld [vmem:[%s2870_s15 + $0x80] sm:$0xff]  ;;  %v524_v20 = vld [vmem:[%s2870_s15 + $0x88] sm:$0xff]  ;;  %v525_v21 = vld [vmem:[%s2870_s15 + $0x90] sm:$0xff]  ;;  %s313_s29 = ssub.s32 400, %s2872_s17 }
  0x73   : > { %s2881_s26 = ssub.s32 %s291_s23, %s2872_s17  ;;  %v541_v6 = vsub.s32 %v508_v2, %v2878_v5  ;;  %v540_v7 = vsub.s32 %v507_v3, %v2878_v5  ;;  %v542_v15 = vsub.s32 %v509_v8, %v2878_v5  ;;  %v2898_v16 = vsub.s32 %v510_v10, %v2878_v5  ;;  %v526_v22 = vld [vmem:[%s2870_s15 + $0x98] sm:$0xff]  ;;  %s410_s24 = ssub.s32 400, %s291_s23  ;;  %v527_v26 = vld [vmem:[%s2870_s15 + $0xa0] sm:$0xff]  ;;  %v528_v32 = vld [vmem:[%s2870_s15 + $0xa8] sm:$0xff] }
  0x74   : > { %v2887_v9 = vstv %s2881_s26  ;;  %p271_p1 = scmp.lt.s32.totalorder %s266_s25, 49  ;;  %v2904_v18 = vsub.s32 %v511_v13, %v2878_v5  ;;  %v2914_v25 = vsub.s32 %v512_v17, %v2878_v5  ;;  %v2927_v30 = vsub.s32 %v523_v19, %v2878_v5  ;;  %v529_v33 = vld [vmem:[%s2870_s15 + $0xb0] sm:$0xff]  ;;  %v530_v38 = vld [vmem:[%s2870_s15 + $0xb8] sm:$0xff]  ;;  %v531_v50 = vld [vmem:[%s2870_s15 + $0xc0] sm:$0xff]  ;;  %p1056_p12 = scmp.gt.s32.totalorder %s2881_s26, 0 }
  0x75   : > { %v865_v11 = vsub.s32 %v541_v6, %v2887_v9  ;;  %v864_v12 = vsub.s32 %v540_v7, %v2887_v9  ;;  %v866_v24 = vsub.s32 %v542_v15, %v2887_v9  ;;  %v867_v29 = vsub.s32 %v2898_v16, %v2887_v9  ;;  %v532_v61 = vld [vmem:[%s2870_s15 + $0xc8] sm:$0xff]  ;;  %v513_v3 = vld [vmem:[%s2870_s15 + $0x30] sm:$0xff]  ;;  %v435_v13 = vld [vmem:[%s2853_s9 + $0x20] sm:$0xff]  ;;  %s1941_s17 = sshll.u32 %s3845_s13, 4  ;;  %s3885_s17 = int_to_ptr.vmem [resolvable:$true] %s1941_s17 }
  0x76   : > { %s3987_s25 = smov (!%p271_p1, %s266_s25), 49  ;;  %v2930_v31 = vsub.s32 %v524_v20, %v2878_v5  ;;  %v868_v35 = vsub.s32 %v2904_v18, %v2887_v9  ;;  %v2940_v36 = vsub.s32 %v525_v21, %v2878_v5  ;;  %v2943_v37 = vsub.s32 %v526_v22, %v2878_v5  ;;  %v533_v8 = vld [vmem:[%s2870_s15 + $0xd0] sm:$0xff] }
  0x77   : > { %900 = vperm.xlu1 %2533, %v865_v11   ;;  %897 = vperm.xlu0 %2532, %v864_v12   ;;  %s2050_s0 = sshll.u32 %s3987_s25, 3  ;;  %v2946_v39 = vstv %s410_s24  ;;  %v880_v40 = vsub.s32 %v2927_v30, %v2887_v9  ;;  %v2958_v42 = vsub.s32 %v527_v26, %v2878_v5  ;;  %v2962_v45 = vstv %s313_s29  ;;  %s2586_s24 = scalar_lea.vmem %s3885_s17, 4096 }
  0x78   : > { %s2951_s16 = scalar_lea.vmem %s3942_s3, %s2050_s0  ;;  %v881_v41 = vsub.s32 %v2930_v31, %v2887_v9  ;;  %v882_v46 = vsub.s32 %v2940_v36, %v2887_v9  ;;  %v883_v47 = vsub.s32 %v2943_v37, %v2887_v9  ;;  %v2969_v48 = vsub.s32 %v528_v32, %v2878_v5  ;;  %v438_v32 = vld [vmem:[%s2853_s9 + $0x38] sm:$0xff]  ;;  %p2587_p10 = scmp.ne.s32.totalorder %s3885_s17, %s2586_s24 }
  0x79   : > { %v2972_v49 = vsub.s32 %v529_v33, %v2878_v5  ;;  %v884_v52 = vsub.s32 %v2958_v42, %v2887_v9  ;;  %v2979_v53 = vsub.s32 %v530_v38, %v2878_v5  ;;  %vm412_vm0 = vcmp.lt.s32.totalorder %v2894_v14, %v2946_v39  ;;  %v334_v54 = vld [vmem:[%s2951_s16] sm:$0xff]  ;;  %v335_v55 = vld [vmem:[%s2951_s16 + $0x8] sm:$0xff]  ;;  %v336_v0 = vld [vmem:[%s2951_s16 + $0x10] sm:$0xff]  ;;  %s2689_s0 = smov [#allocation8]  }
  0x7a   : > { %v885_v58 = vsub.s32 %v2969_v48, %v2887_v9  ;;  %vm413_vm1 = vcmp.lt.s32.totalorder %v295_v23, %v2946_v39  ;;  %v2998_v63 = vsub.s32 %v531_v50, %v2878_v5  ;;  %vm315_vm3 = vcmp.lt.s32.totalorder %v2894_v14, %v2962_v45  ;;  %v337_v2 = vld [vmem:[%s2951_s16 + $0x18] sm:$0xff]  ;;  %v338_v19 = vld [vmem:[%s2951_s16 + $0x20] sm:$0xff]  ;;  %v339_v20 = vld [vmem:[%s2951_s16 + $0x28] sm:$0xff]  ;;  %p2588_p11 = pnand %p2587_p10, %p2798_p7  ;;  %s2590_s29 = sshll.u32 %s2689_s0, 4  ;;  %s2591_s29 = int_to_ptr.vmem [resolvable:$false] %s2590_s29 }
  0x7b   : > { %579 = vperm.xlu1 %2533, %v541_v6   ;;  %576 = vperm.xlu0 %2532, %v540_v7   ;;  %v886_v59 = vsub.s32 %v2972_v49, %v2887_v9  ;;  %v887_v62 = vsub.s32 %v2979_v53, %v2887_v9  ;;  %vm2354_vm2 = vmpackc.low %vm413_vm1, %vm412_vm0  ;;  %vm316_vm4 = vcmp.lt.s32.totalorder %v295_v23, %v2962_v45  ;;  %v3026_v17 = vadd.s32 48, %v2894_v14  ;;  %s2592_s11 = scalar_lea.vmem %s2591_s29, 8192  ;;  %p2593_p0 = scmp.lt.s32.totalorder %s3885_s17, %s2591_s29 }
  0x7c   : > { %2355 = vmatpush1.bf16.msk.msra.mxu1 %vm2354_vm2, %v2353_v60  ;;  %v2389_v6 = vpack.c.bf16 %v335_v55, %v334_v54  ;;  %vm2390_vm5 = vmpackc.low %vm316_vm4, %vm315_vm3  ;;  %vm414_vm6 = vcmp.lt.s32.totalorder %v2919_v27, %v2946_v39  ;;  %vm415_vm7 = vcmp.lt.s32.totalorder %v2922_v28, %v2946_v39  ;;  %v2357_v7 = vpack.c.bf16 %v434_v56, %v433_v51  ;;  %v340_v54 = vld [vmem:[%s2951_s16 + $0x30] sm:$0xff]  ;;  %v341_v55 = vld [vmem:[%s2951_s16 + $0x38] sm:$0xff]  ;;  %p2589_p13 = pneg %p2588_p11  ;;  %p2594_p3 = scmp.lt.s32.totalorder %s2592_s11, %s2586_s24 }
  0x7d   : > { %v888_v10 = vsub.s32 %v2998_v63, %v2887_v9  ;;  %vm3014_vm8 = vmpackc.low %vm415_vm7, %vm414_vm6  ;;  %v3019_v12 = vsub.s32 %v532_v61, %v2878_v5  ;;  %vm317_vm9 = vcmp.lt.s32.totalorder %v2919_v27, %v2962_v45  ;;  %2356 = vmatprep.subr.bf16.mxu1 %v2686_v1  ;;  %vm318_vm10 = vcmp.lt.s32.totalorder %v2922_v28, %v2962_v45  ;;  %v534_v28 = vld [vmem:[%s2870_s15 + $0xd8] sm:$0xff]  ;;  %v437_v27 = vld [vmem:[%s2853_s9 + $0x30] sm:$0xff] }
  0x7e   : > { %2391 = vmatpush1.bf16.msk.msra.mxu0 %vm2390_vm5, %v2389_v6  ;;  %vm416_vm11 = vcmp.lt.s32.totalorder %v2935_v34, %v2946_v39  ;;  %v301_v21 = vadd.s32 56, %v2894_v14  ;;  %v3037_v22 = vsub.s32 %v513_v3, %v2878_v5  ;;  %vm3045_vm12 = vmpackc.low %vm318_vm10, %vm317_vm9  ;;  %vm417_vm13 = vcmp.lt.s32.totalorder %v2987_v57, %v2946_v39  ;;  %p2595_p4 = por %p2594_p3, %p2593_p0 }
  0x7f   : > { %582 = vperm.xlu1 %2533, %v542_v15   ;;  %903 = vperm.xlu0 %2532, %v866_v24   ;;  %v436_v15 = vld [vmem:[%s2853_s9 + $0x28] sm:$0xff]  ;;  %v889_v23 = vsub.s32 %v3019_v12, %v2887_v9  ;;  %v3052_v26 = vsub.s32 %v533_v8, %v2878_v5  ;;  %vm319_vm14 = vcmp.lt.s32.totalorder %v2935_v34, %v2962_v45  ;;  %vm3072_vm0 = vmpackc.low %vm417_vm13, %vm416_vm11  ;;  %v3079_v50 = vadd.s32 64, %v2894_v14  ;;  %v439_v34 = vld [vmem:[%s2853_s9 + $0x40] sm:$0xff] }
  0x80   : > { %2392 = vmatprep.subr.bf16.mxu0 %v2686_v1  ;;  %2359 = vmatpush1.bf16.msk.msra.mxu1 %vm3014_vm8, %v2357_v7  ;;  %vm320_vm15 = vcmp.lt.s32.totalorder %v2987_v57, %v2962_v45  ;;  %v869_v33 = vsub.s32 %v2914_v25, %v2887_v9  ;;  %v2397_v44 = vpack.c.bf16 %v339_v20, %v338_v19  ;;  %v303_v56 = vadd.s32 72, %v2894_v14  ;;  %v440_v57 = vld [vmem:[%s2853_s9 + $0x48] sm:$0xff]  ;;  %p2596_p5 = pnand %p2595_p4, %p2589_p13 }
  0x81   : > { %v890_v43 = vsub.s32 %v3052_v26, %v2887_v9  ;;  %2360 = vmatprep.subr.bf16.mxu1 %v2686_v1  ;;  %vm418_vm1 = vcmp.lt.s32.totalorder %v3026_v17, %v2946_v39  ;;  %vm419_vm2 = vcmp.lt.s32.totalorder %v301_v21, %v2946_v39  ;;  %v3090_v51 = vsub.s32 %v534_v28, %v2878_v5  ;;  %vm3104_vm3 = vmpackc.low %vm320_vm15, %vm319_vm14  ;;  %v342_v19 = vld [vmem:[%s2951_s16 + $0x40] sm:$0xff]  ;;  %v343_v20 = vld [vmem:[%s2951_s16 + $0x48] sm:$0xff] }
  0x82   : > { %v870_v60 = vsub.s32 %v3037_v22, %v2887_v9  ;;  %vm321_vm4 = vcmp.lt.s32.totalorder %v3026_v17, %v2962_v45  ;;  %vm322_vm5 = vcmp.lt.s32.totalorder %v301_v21, %v2962_v45  ;;  %vm3128_vm6 = vmpackc.low %vm419_vm2, %vm418_vm1  ;;  %v2401_v11 = vpack.c.bf16 %v341_v55, %v340_v54  ;;  %v442_v54 = vld [vmem:[%s2853_s9 + $0x58] sm:$0xff]  ;;  %v516_v55 = vld [vmem:[%s2870_s15 + $0x48] sm:$0xff] }
  0x83   : > { %585 = vperm.xlu1 %2533, %v2898_v16   ;;  %906 = vperm.xlu0 %2532, %v867_v29   ;;  %v2393_v16 = vpack.c.bf16 %v337_v2, %v336_v0  ;;  %v2361_v29 = vpack.c.bf16 %v436_v15, %v435_v13  ;;  %v2365_v0 = vpack.c.bf16 %v438_v32, %v437_v27  ;;  %v536_v2 = vld [vmem:[%s2870_s15 + $0xe8] sm:$0xff]  ;;  %v304_v13 = vadd.s32 80, %v2894_v14  ;;  %v537_v15 = vld [vmem:[%s2870_s15 + $0xf0] sm:$0xff]  ;;  %vm3155_vm9 = vmpackc.low %vm322_vm5, %vm321_vm4 }
  0x84   : > { %v891_v3 = vsub.s32 %v3090_v51, %v2887_v9  ;;  %vm420_vm7 = vcmp.lt.s32.totalorder %v3079_v50, %v2946_v39  ;;  %vm421_vm8 = vcmp.lt.s32.totalorder %v303_v56, %v2946_v39  ;;  %v305_v24 = vadd.s32 88, %v2894_v14  ;;  %v538_v32 = vld [vmem:[%s2870_s15 + $0xf8] sm:$0xff] }
  0x85   : > { %2395 = vmatpush1.bf16.msk.msra.mxu0 %vm3045_vm12, %v2393_v16  ;;  %2363 = vmatpush1.bf16.msk.msra.mxu1 %vm3072_vm0, %v2361_v29  ;;  %v3147_v28 = vsub.s32 %v536_v2, %v2878_v5  ;;  %v2369_v27 = vpack.c.bf16 %v440_v57, %v439_v34  ;;  %vm323_vm10 = vcmp.lt.s32.totalorder %v3079_v50, %v2962_v45  ;;  %vm3178_vm12 = vmpackc.low %vm421_vm8, %vm420_vm7  ;;  %v344_v2 = vld [vmem:[%s2951_s16 + $0x50] sm:$0xff]  ;;  %v345_v34 = vld [vmem:[%s2951_s16 + $0x58] sm:$0xff] }
  0x86   : > { %2396 = vmatprep.subr.bf16.mxu0 %v2686_v1  ;;  %2364 = vmatprep.subr.bf16.mxu1 %v2686_v1  ;;  %vm324_vm11 = vcmp.lt.s32.totalorder %v303_v56, %v2962_v45  ;;  %v3167_v21 = vsub.s32 %v537_v15, %v2878_v5  ;;  %vm422_vm13 = vcmp.lt.s32.totalorder %v304_v13, %v2946_v39  ;;  %v443_v15 = vld [vmem:[%s2853_s9 + $0x60] sm:$0xff] }
  0x87   : > { %588 = vperm.xlu1 %2533, %v2904_v18   ;;  %909 = vperm.xlu0 %2532, %v868_v35   ;;  %v535_v18 = vld [vmem:[%s2870_s15 + $0xe0] sm:$0xff]  ;;  %v514_v35 = vld [vmem:[%s2870_s15 + $0x38] sm:$0xff]  ;;  %v893_v17 = vsub.s32 %v3147_v28, %v2887_v9  ;;  %vm423_vm14 = vcmp.lt.s32.totalorder %v305_v24, %v2946_v39  ;;  %vm3200_vm15 = vmpackc.low %vm324_vm11, %vm323_vm10  ;;  %v3207_v57 = vsub.s32 %v538_v32, %v2878_v5 }
  0x88   : > { %v3119_v6 = vsub.s32 %v535_v18, %v2878_v5  ;;  %v547_v7 = vsub.s32 %v514_v35, %v2878_v5  ;;  %v2405_v18 = vpack.c.bf16 %v343_v20, %v342_v19  ;;  %v441_v35 = vld [vmem:[%s2853_s9 + $0x50] sm:$0xff]  ;;  %v894_v61 = vsub.s32 %v3167_v21, %v2887_v9  ;;  %vm3219_vm2 = vmpackc.low %vm423_vm14, %vm422_vm13 }
  0x89   : > { %2399 = vmatpush1.bf16.msk.msra.mxu0 %vm3104_vm3, %v2397_v44  ;;  %2367 = vmatpush1.bf16.msk.msra.mxu1 %vm3128_vm6, %v2365_v0  ;;  %v2373_v8 = vpack.c.bf16 %v442_v54, %v441_v35  ;;  %vm325_vm0 = vcmp.lt.s32.totalorder %v304_v13, %v2962_v45  ;;  %vm326_vm1 = vcmp.lt.s32.totalorder %v305_v24, %v2962_v45  ;;  %v308_v19 = vadd.s32 112, %v2894_v14  ;;  %v517_v20 = vld [vmem:[%s2870_s15 + $0x50] sm:$0xff]  ;;  %v347_v44 = vld [vmem:[%s2951_s16 + $0x68] sm:$0xff]  ;;  %v518_v0 = vld [vmem:[%s2870_s15 + $0x58] sm:$0xff] }
  0x8a   : > { %v892_v16 = vsub.s32 %v3119_v6, %v2887_v9  ;;  %2400 = vmatprep.subr.bf16.mxu0 %v2686_v1  ;;  %2368 = vmatprep.subr.bf16.mxu1 %v2686_v1  ;;  %v549_v56 = vsub.s32 %v516_v55, %v2878_v5  ;;  %v2409_v29 = vpack.c.bf16 %v345_v34, %v344_v2  ;;  %vm3240_vm5 = vmpackc.low %vm326_vm1, %vm325_vm0  ;;  %v445_v35 = vld [vmem:[%s2853_s9 + $0x70] sm:$0xff]  ;;  %v446_v54 = vld [vmem:[%s2853_s9 + $0x78] sm:$0xff]  ;;  %v310_v55 = vadd.s32 128, %v2894_v14 }
  0x8b   : > { %591 = vperm.xlu1 %2533, %v2914_v25   ;;  %912 = vperm.xlu0 %2532, %v869_v33   ;;  %v515_v25 = vld [vmem:[%s2870_s15 + $0x40] sm:$0xff]  ;;  %v871_v33 = vsub.s32 %v547_v7, %v2887_v9  ;;  %v550_v24 = vsub.s32 %v517_v20, %v2878_v5  ;;  %v311_v2 = vadd.s32 136, %v2894_v14  ;;  %v351_v32 = vld [vmem:[%s2951_s16 + $0x88] sm:$0xff] }
  0x8c   : > { %v548_v38 = vsub.s32 %v515_v25, %v2878_v5  ;;  %v444_v25 = vld [vmem:[%s2853_s9 + $0x68] sm:$0xff]  ;;  %v873_v13 = vsub.s32 %v549_v56, %v2887_v9 }
  0x8d   : > { %2403 = vmatpush1.bf16.msk.msra.mxu0 %vm3155_vm9, %v2401_v11  ;;  %2371 = vmatpush1.bf16.msk.msra.mxu1 %vm3178_vm12, %v2369_v27  ;;  %v309_v27 = vadd.s32 120, %v2894_v14  ;;  %vm426_vm9 = vcmp.lt.s32.totalorder %v308_v19, %v2946_v39  ;;  %v2381_v11 = vpack.c.bf16 %v446_v54, %v445_v35  ;;  %vm329_vm12 = vcmp.lt.s32.totalorder %v308_v19, %v2962_v45  ;;  %v519_v20 = vld [vmem:[%s2870_s15 + $0x60] sm:$0xff]  ;;  %v521_v54 = vld [vmem:[%s2870_s15 + $0x70] sm:$0xff] }
  0x8e   : > { %2404 = vmatprep.subr.bf16.mxu0 %v2686_v1  ;;  %v872_v50 = vsub.s32 %v548_v38, %v2887_v9  ;;  %2372 = vmatprep.subr.bf16.mxu1 %v2686_v1  ;;  %vm429_vm0 = vcmp.lt.s32.totalorder %v311_v2, %v2946_v39  ;;  %v312_v19 = vadd.s32 144, %v2894_v14 }
  0x8f   : > { %594 = vperm.xlu1 %2533, %v3037_v22   ;;  %915 = vperm.xlu0 %2532, %v870_v60   ;;  %v306_v22 = vadd.s32 96, %v2894_v14  ;;  %v307_v60 = vadd.s32 104, %v2894_v14  ;;  %vm427_vm10 = vcmp.lt.s32.totalorder %v309_v27, %v2946_v39  ;;  %vm330_vm13 = vcmp.lt.s32.totalorder %v309_v27, %v2962_v45  ;;  %v520_v27 = vld [vmem:[%s2870_s15 + $0x68] sm:$0xff] }
  0x90   : > { %vm2382_vm14 = vmpackc.low %vm427_vm10, %vm426_vm9  ;;  %v553_v35 = vsub.s32 %v520_v27, %v2878_v5  ;;  %v449_v14 = vld [vmem:[%s2853_s9 + $0x90] sm:$0xff] }
  0x91   : > { %2407 = vmatpush1.bf16.msk.msra.mxu0 %vm3200_vm15, %v2405_v18  ;;  %vm424_vm3 = vcmp.lt.s32.totalorder %v306_v22, %v2946_v39  ;;  %vm425_vm4 = vcmp.lt.s32.totalorder %v307_v60, %v2946_v39  ;;  %2375 = vmatpush1.bf16.msk.msra.mxu1 %vm3219_vm2, %v2373_v8  ;;  %v2377_v18 = vpack.c.bf16 %v444_v25, %v443_v15  ;;  %v348_v8 = vld [vmem:[%s2951_s16 + $0x70] sm:$0xff]  ;;  %v447_v15 = vld [vmem:[%s2853_s9 + $0x80] sm:$0xff]  ;;  %v448_v25 = vld [vmem:[%s2853_s9 + $0x88] sm:$0xff]  ;;  %s1057_s9 = scalar_select %p1056_p12, 1, 0 }
  0x92   : > { %2408 = vmatprep.subr.bf16.mxu0 %v2686_v1  ;;  %vm327_vm6 = vcmp.lt.s32.totalorder %v306_v22, %v2962_v45  ;;  %vm328_vm7 = vcmp.lt.s32.totalorder %v307_v60, %v2962_v45  ;;  %vm2378_vm8 = vmpackc.low %vm425_vm4, %vm424_vm3  ;;  %2376 = vmatprep.subr.bf16.mxu1 %v2686_v1  ;;  %v874_v22 = vsub.s32 %v550_v24, %v2887_v9 }
  0x93   : > { %597 = vperm.xlu1 %2533, %v547_v7   ;;  %918 = vperm.xlu0 %2532, %v871_v33   ;;  %v895_v7 = vsub.s32 %v3207_v57, %v2887_v9  ;;  %v346_v33 = vld [vmem:[%s2951_s16 + $0x60] sm:$0xff]  ;;  %vm3269_vm11 = vmpackc.low %vm328_vm7, %vm327_vm6  ;;  %v551_v60 = vsub.s32 %v518_v0, %v2878_v5  ;;  %vm428_vm15 = vcmp.lt.s32.totalorder %v310_v55, %v2946_v39 }
  0x94   : > { %vm2418_vm1 = vmpackc.low %vm330_vm13, %vm329_vm12  ;;  %vm331_vm2 = vcmp.lt.s32.totalorder %v310_v55, %v2962_v45  ;;  %vm332_vm3 = vcmp.lt.s32.totalorder %v311_v2, %v2962_v45  ;;  %vm430_vm6 = vcmp.lt.s32.totalorder %v312_v19, %v2946_v39  ;;  %v2687_v55 = vmov 0.0   ;;  %v522_v2 = vld [vmem:[%s2870_s15 + $0x78] sm:$0xff]  ;;  %s2351_s15 = sshll.u32 %s2762_s8, 12  ;;  %s3890_s8 = scalar_lea.sflag [#allocation7], %s256_s18 }
  0x95   : > { %2411 = vmatpush1.bf16.msk.msra.mxu0 %vm3240_vm5, %v2409_v29  ;;  %2379 = vmatpush1.bf16.msk.msra.mxu1 %vm2378_vm8, %v2377_v18  ;;  %v552_v18 = vsub.s32 %v519_v20, %v2878_v5  ;;  %vm2386_vm4 = vmpackc.low %vm429_vm0, %vm428_vm15  ;;  %vm333_vm7 = vcmp.lt.s32.totalorder %v312_v19, %v2962_v45  ;;  %v877_v0 = vsub.s32 %v553_v35, %v2887_v9  ;;  %vm1252_vm13 = vcmask 195584   ;;  %s3883_s26 = scalar_lea.hbm %s3944_s5, %s2351_s15 }
  0x96   : > { %2412 = vmatprep.subr.bf16.mxu0 %v2686_v1  ;;  %2380 = vmatprep.subr.bf16.mxu1 %v2686_v1  ;;  %vm2422_vm5 = vmpackc.low %vm332_vm3, %vm331_vm2  ;;  %v555_v34 = vsub.s32 %v522_v2, %v2878_v5 }
  0x97   : > { %600 = vperm.xlu1 %2533, %v548_v38   ;;  %921 = vperm.xlu0 %2532, %v872_v50   ;;  %v2413_v38 = vpack.c.bf16 %v347_v44, %v346_v33  ;;  %v349_v50 = vld [vmem:[%s2951_s16 + $0x78] sm:$0xff]  ;;  %v2385_v33 = vpack.c.bf16 %v448_v25, %v447_v15  ;;  %v875_v44 = vsub.s32 %v551_v60, %v2887_v9 }
  0x98   : > { %v2417_v29 = vpack.c.bf16 %v349_v50, %v348_v8  ;;  %v879_v45 = vsub.s32 %v555_v34, %v2887_v9 }
  0x99   : > { %2415 = vmatpush1.bf16.msk.msra.mxu0 %vm3269_vm11, %v2413_v38  ;;  %2383 = vmatpush1.bf16.msk.msra.mxu1 %vm2382_vm14, %v2381_v11  ;;  %v554_v38 = vsub.s32 %v521_v54, %v2878_v5  ;;  %v3381_v5 = vand.u32 127, %v293_v4 }
  0x9a   : > { %2416 = vmatprep.subr.bf16.mxu0 %v2686_v1  ;;  %2384 = vmatprep.subr.bf16.mxu1 %v2686_v1 }
  0x9b   : > { %603 = vperm.xlu1 %2533, %v549_v56   ;;  %924 = vperm.xlu0 %2532, %v873_v13   ;;  %v350_v56 = vld [vmem:[%s2951_s16 + $0x80] sm:$0xff]  ;;  %v878_v39 = vsub.s32 %v554_v38, %v2887_v9 }
  0x9c   : > { %v2421_v13 = vpack.c.bf16 %v351_v32, %v350_v56 }
  0x9d   : > { %2419 = vmatpush1.bf16.msk.msra.mxu0 %vm2418_vm1, %v2417_v29  ;;  %2387 = vmatpush1.bf16.msk.msra.mxu1 %vm2386_vm4, %v2385_v33 }
  0x9e   : > { %2420 = vmatprep.subr.bf16.mxu0 %v2686_v1  ;;  %1385 = vmatprep.subr.mxu1 %v2687_v55  ;;  %v352_v1 = vld [vmem:[%s2951_s16 + $0x90] sm:$0xff] }
  0x9f   : > { %606 = vperm.xlu1 %2533, %v550_v24   ;;  %927 = vperm.xlu0 %2532, %v874_v22   ;;  %v876_v24 = vsub.s32 %v552_v18, %v2887_v9 }
  0xa1   : > { %2423 = vmatpush1.bf16.msk.msra.mxu0 %vm2422_vm5, %v2421_v13  ;;  %2197 = vmatpush1.msk.msra.mxu1 %vm430_vm6, %v449_v14 }
  0xa2   : > { %1706 = vmatprep.subr.mxu0 %v2687_v55 }
  0xa3   : > { %609 = vperm.xlu1 %2533, %v551_v60   ;;  %930 = vperm.xlu0 %2532, %v875_v44  }
  0xa5   : > { %2280 = vmatpush1.msk.msra.mxu0 %vm333_vm7, %v352_v1 }
  0xa7   : > { %612 = vperm.xlu1 %2533, %v552_v18   ;;  %933 = vperm.xlu0 %2532, %v876_v24  }
  0xab   : > { %615 = vperm.xlu1 %2533, %v553_v35   ;;  %936 = vperm.xlu0 %2532, %v877_v0  }
  0xaf   : > { %618 = vperm.xlu1 %2533, %v554_v38   ;;  %939 = vperm.xlu0 %2532, %v878_v39  }
  0xb3   : > { %621 = vperm.xlu1 %2533, %v555_v34   ;;  %942 = vperm.xlu0 %2532, %v879_v45  }
  0xb7   : > { %624 = vperm.xlu1 %2533, %v2927_v30   ;;  %945 = vperm.xlu0 %2532, %v880_v40   ;;  %v3388_v30 = vadd.s32 128, %v3381_v5 }
  0xbb   : > { %627 = vperm.xlu1 %2533, %v2930_v31   ;;  %948 = vperm.xlu0 %2532, %v881_v41   ;;  %v1058_v31 = vstv %s1057_s9 }
  0xbc   : > { %vm3391_vm9 = vcmp.eq.s32.totalorder %v1058_v31, 1 }
  0xbf   : > { %630 = vperm.xlu1 %2533, %v2940_v36   ;;  %951 = vperm.xlu0 %2532, %v882_v46  }
  0xc3   : > { %633 = vperm.xlu1 %2533, %v2943_v37   ;;  %954 = vperm.xlu0 %2532, %v883_v47   ;;  %v2688_v47 = vmov 1.0  }
  0xc7   : > { %636 = vperm.xlu1 %2533, %v2958_v42   ;;  %957 = vperm.xlu0 %2532, %v884_v52  }
  0xcb   : > { %639 = vperm.xlu1 %2533, %v2969_v48   ;;  %960 = vperm.xlu0 %2532, %v885_v58  }
  0xcf   : > { %642 = vperm.xlu1 %2533, %v2972_v49   ;;  %963 = vperm.xlu0 %2532, %v886_v59  }
  0xd3   : > { %645 = vperm.xlu1 %2533, %v2979_v53   ;;  %966 = vperm.xlu0 %2532, %v887_v62  }
  0xd7   : > { %648 = vperm.xlu1 %2533, %v2998_v63   ;;  %969 = vperm.xlu0 %2532, %v888_v10  }
  0xdb   : > { %651 = vperm.xlu1 %2533, %v3019_v12   ;;  %972 = vperm.xlu0 %2532, %v889_v23  }
  0xdf   : > { %654 = vperm.xlu1 %2533, %v3052_v26   ;;  %975 = vperm.xlu0 %2532, %v890_v43  }
  0xe3   : > { %657 = vperm.xlu1 %2533, %v3090_v51   ;;  %978 = vperm.xlu0 %2532, %v891_v3  }
  0xe7   : > { %660 = vperm.xlu1 %2533, %v3119_v6   ;;  %981 = vperm.xlu0 %2532, %v892_v16  }
  0xeb   : > { %663 = vperm.xlu1 %2533, %v3147_v28   ;;  %984 = vperm.xlu0 %2532, %v893_v17  }
  0xef   : > { %666 = vperm.xlu1 %2533, %v3167_v21   ;;  %987 = vperm.xlu0 %2532, %v894_v61  }
  0xf3   : > { %669 = vperm.xlu1 %2533, %v3207_v57   ;;  %990 = vperm.xlu0 %2532, %v895_v7  }
  0xf6   : > { %v901_v36 = vpop.permute.xlu1 %900  ;;  %v898_v37 = vpop.permute.xlu0 %897 }
  0xf7   : > { %vm995_vm8 = vcmp.eq.s32.totalorder %v901_v36, %v3388_v30  ;;  %vm993_vm10 = vcmp.eq.s32.totalorder %v898_v37, %v3388_v30  ;;  %vm992_vm12 = vcmp.eq.s32.totalorder %v898_v37, %v3381_v5  ;;  %vm994_vm1 = vcmp.eq.s32.totalorder %v901_v36, %v3381_v5 }
  0xf8   : > { %vm1063_vm11 = vmand %vm995_vm8, %vm3391_vm9 }
  0xf9   : > { %vm1061_vm14 = vmand %vm993_vm10, %vm3391_vm9  ;;  %v2118_v46 = vsel %vm1063_vm11, 1.0, %v2687_v55 }
  0xfa   : > { %v580_v4 = vpop.permute.xlu1 %579  ;;  %v577_v9 = vpop.permute.xlu0 %576  ;;  %v2116_v41 = vsel %vm1061_vm14, 1.0, %v2687_v55  ;;  %vm1060_vm2 = vmand %vm992_vm12, %vm3391_vm9 }
  0xfb   : > { %vm672_vm15 = vcmp.eq.s32.totalorder %v577_v9, %v3388_v30  ;;  %vm674_vm0 = vcmp.eq.s32.totalorder %v580_v4, %v3388_v30  ;;  %2198 = vmatprep.mubr.msk.f32.mxu1 %vm1252_vm13, %v2116_v41  ;;  %vm671_vm3 = vcmp.eq.s32.totalorder %v577_v9, %v3381_v5  ;;  %vm1062_vm5 = vmand %vm994_vm1, %vm3391_vm9  ;;  %vm673_vm7 = vcmp.eq.s32.totalorder %v580_v4, %v3381_v5 }
  0xfc   : > { %v2052_v42 = vsel %vm672_vm15, 1.0, %v2687_v55  ;;  %2199 = vmatmul.mubr.msk.f32.vlgmr.msra.gmra.mrb[0].mxu1 %vm1060_vm2, %v2688_v47  ;;  %v2054_v52 = vsel %vm674_vm0, 1.0, %v2687_v55 }
  0xfd   : > { %2281 = vmatprep.mubr.msk.f32.mxu0 %vm1252_vm13, %v2052_v42  ;;  %2200 = vmatprep.mubr.msk.f32.mxu1 %vm1252_vm13, %v2118_v46 }
  0xfe   : > { %v583_v48 = vpop.permute.xlu1 %582  ;;  %v904_v49 = vpop.permute.xlu0 %903  ;;  %2282 = vmatmul.mubr.msk.f32.vlgmr.msra.gmra.mrb[0].mxu0 %vm671_vm3, %v2688_v47 }
  0xff   : > { %vm997_vm4 = vcmp.eq.s32.totalorder %v904_v49, %v3388_v30  ;;  %vm676_vm6 = vcmp.eq.s32.totalorder %v583_v48, %v3388_v30  ;;  %2283 = vmatprep.mubr.msk.f32.mxu0 %vm1252_vm13, %v2054_v52  ;;  %vm996_vm8 = vcmp.eq.s32.totalorder %v904_v49, %v3381_v5  ;;  %vm675_vm15 = vcmp.eq.s32.totalorder %v583_v48, %v3381_v5 }
 0x100   : > { %vm1065_vm10 = vmand %vm997_vm4, %vm3391_vm9  ;;  %2201 = vmatmul.mubr.msk.f32.gmra.mrb[2].mxu1 %vm1062_vm5, %v2688_v47  ;;  %v2056_v62 = vsel %vm676_vm6, 1.0, %v2687_v55 }
 0x101   : > { %v2120_v58 = vsel %vm1065_vm10, 1.0, %v2687_v55  ;;  %vm1064_vm12 = vmand %vm996_vm8, %vm3391_vm9 }
 0x102   : > { %v586_v53 = vpop.permute.xlu1 %585  ;;  %v907_v59 = vpop.permute.xlu0 %906  ;;  %2284 = vmatmul.mubr.msk.f32.gmra.mrb[2].mxu0 %vm673_vm7, %v2688_v47  ;;  %2202 = vmatprep.mubr.msk.f32.mxu1 %vm1252_vm13, %v2120_v58 }
 0x103   : > { %vm999_vm11 = vcmp.eq.s32.totalorder %v907_v59, %v3388_v30  ;;  %vm678_vm14 = vcmp.eq.s32.totalorder %v586_v53, %v3388_v30  ;;  %2285 = vmatprep.mubr.msk.f32.mxu0 %vm1252_vm13, %v2056_v62  ;;  %vm998_vm0 = vcmp.eq.s32.totalorder %v907_v59, %v3381_v5  ;;  %vm677_vm5 = vcmp.eq.s32.totalorder %v586_v53, %v3381_v5 }
 0x104   : > { %vm1067_vm1 = vmand %vm999_vm11, %vm3391_vm9  ;;  %2203 = vmatmul.mubr.msk.f32.gmra.mrb[4].mxu1 %vm1064_vm12, %v2688_v47  ;;  %v2058_v23 = vsel %vm678_vm14, 1.0, %v2687_v55 }
 0x105   : > { %v2122_v10 = vsel %vm1067_vm1, 1.0, %v2687_v55  ;;  %vm1066_vm3 = vmand %vm998_vm0, %vm3391_vm9 }
 0x106   : > { %v589_v63 = vpop.permute.xlu1 %588  ;;  %v910_v12 = vpop.permute.xlu0 %909  ;;  %2286 = vmatmul.mubr.msk.f32.gmra.mrb[4].mxu0 %vm675_vm15, %v2688_v47  ;;  %2204 = vmatprep.mubr.msk.f32.mxu1 %vm1252_vm13, %v2122_v10 }
 0x107   : > { %vm1001_vm2 = vcmp.eq.s32.totalorder %v910_v12, %v3388_v30  ;;  %vm680_vm4 = vcmp.eq.s32.totalorder %v589_v63, %v3388_v30  ;;  %2287 = vmatprep.mubr.msk.f32.mxu0 %vm1252_vm13, %v2058_v23  ;;  %vm1000_vm6 = vcmp.eq.s32.totalorder %v910_v12, %v3381_v5  ;;  %vm679_vm12 = vcmp.eq.s32.totalorder %v589_v63, %v3381_v5 }
 0x108   : > { %vm1069_vm7 = vmand %vm1001_vm2, %vm3391_vm9  ;;  %2205 = vmatmul.mubr.msk.f32.gmra.mrb[6].mxu1 %vm1066_vm3, %v2688_v47  ;;  %v2060_v3 = vsel %vm680_vm4, 1.0, %v2687_v55 }
 0x109   : > { %v2124_v43 = vsel %vm1069_vm7, 1.0, %v2687_v55  ;;  %vm1068_vm10 = vmand %vm1000_vm6, %vm3391_vm9 }
 0x10a   : > { %v592_v26 = vpop.permute.xlu1 %591  ;;  %v913_v51 = vpop.permute.xlu0 %912  ;;  %2288 = vmatmul.mubr.msk.f32.gmra.mrb[6].mxu0 %vm677_vm5, %v2688_v47  ;;  %2206 = vmatprep.mubr.msk.f32.mxu1 %vm1252_vm13, %v2124_v43 }
 0x10b   : > { %vm1003_vm8 = vcmp.eq.s32.totalorder %v913_v51, %v3388_v30  ;;  %vm682_vm11 = vcmp.eq.s32.totalorder %v592_v26, %v3388_v30  ;;  %2289 = vmatprep.mubr.msk.f32.mxu0 %vm1252_vm13, %v2060_v3  ;;  %vm1002_vm14 = vcmp.eq.s32.totalorder %v913_v51, %v3381_v5  ;;  %vm681_vm3 = vcmp.eq.s32.totalorder %v592_v26, %v3381_v5 }
 0x10c   : > { %vm1071_vm15 = vmand %vm1003_vm8, %vm3391_vm9  ;;  %2207 = vmatmul.mubr.msk.f32.gmra.mrb[8].mxu1 %vm1068_vm10, %v2688_v47  ;;  %v2062_v17 = vsel %vm682_vm11, 1.0, %v2687_v55 }
 0x10d   : > { %v2126_v16 = vsel %vm1071_vm15, 1.0, %v2687_v55  ;;  %vm1070_vm1 = vmand %vm1002_vm14, %vm3391_vm9 }
 0x10e   : > { %v595_v6 = vpop.permute.xlu1 %594  ;;  %v916_v28 = vpop.permute.xlu0 %915  ;;  %2290 = vmatmul.mubr.msk.f32.gmra.mrb[8].mxu0 %vm679_vm12, %v2688_v47  ;;  %2208 = vmatprep.mubr.msk.f32.mxu1 %vm1252_vm13, %v2126_v16 }
 0x10f   : > { %vm1005_vm0 = vcmp.eq.s32.totalorder %v916_v28, %v3388_v30  ;;  %vm684_vm2 = vcmp.eq.s32.totalorder %v595_v6, %v3388_v30  ;;  %2291 = vmatprep.mubr.msk.f32.mxu0 %vm1252_vm13, %v2062_v17  ;;  %vm1004_vm4 = vcmp.eq.s32.totalorder %v916_v28, %v3381_v5  ;;  %vm683_vm10 = vcmp.eq.s32.totalorder %v595_v6, %v3381_v5 }
 0x110   : > { %vm1073_vm5 = vmand %vm1005_vm0, %vm3391_vm9  ;;  %2209 = vmatmul.mubr.msk.f32.gmra.mrb[10].mxu1 %vm1070_vm1, %v2688_v47  ;;  %v2064_v7 = vsel %vm684_vm2, 1.0, %v2687_v55 }
 0x111   : > { %v2128_v61 = vsel %vm1073_vm5, 1.0, %v2687_v55  ;;  %vm1072_vm7 = vmand %vm1004_vm4, %vm3391_vm9 }
 0x112   : > { %v598_v21 = vpop.permute.xlu1 %597  ;;  %v919_v57 = vpop.permute.xlu0 %918  ;;  %2292 = vmatmul.mubr.msk.f32.gmra.mrb[10].mxu0 %vm681_vm3, %v2688_v47  ;;  %2210 = vmatprep.mubr.msk.f32.mxu1 %vm1252_vm13, %v2128_v61 }
 0x113   : > { %vm1007_vm6 = vcmp.eq.s32.totalorder %v919_v57, %v3388_v30  ;;  %vm686_vm8 = vcmp.eq.s32.totalorder %v598_v21, %v3388_v30  ;;  %2293 = vmatprep.mubr.msk.f32.mxu0 %vm1252_vm13, %v2064_v7  ;;  %vm1006_vm11 = vcmp.eq.s32.totalorder %v919_v57, %v3381_v5  ;;  %vm685_vm1 = vcmp.eq.s32.totalorder %v598_v21, %v3381_v5 }
 0x114   : > { %vm1075_vm12 = vmand %vm1007_vm6, %vm3391_vm9  ;;  %2211 = vmatmul.mubr.msk.f32.gmra.mrb[12].mxu1 %vm1072_vm7, %v2688_v47  ;;  %v2066_v22 = vsel %vm686_vm8, 1.0, %v2687_v55 }
 0x115   : > { %v2130_v50 = vsel %vm1075_vm12, 1.0, %v2687_v55  ;;  %vm1074_vm15 = vmand %vm1006_vm11, %vm3391_vm9 }
 0x116   : > { %v601_v8 = vpop.permute.xlu1 %600  ;;  %v922_v11 = vpop.permute.xlu0 %921  ;;  %2294 = vmatmul.mubr.msk.f32.gmra.mrb[12].mxu0 %vm683_vm10, %v2688_v47  ;;  %2212 = vmatprep.mubr.msk.f32.mxu1 %vm1252_vm13, %v2130_v50 }
 0x117   : > { %vm1009_vm14 = vcmp.eq.s32.totalorder %v922_v11, %v3388_v30  ;;  %vm688_vm0 = vcmp.eq.s32.totalorder %v601_v8, %v3388_v30  ;;  %2295 = vmatprep.mubr.msk.f32.mxu0 %vm1252_vm13, %v2066_v22  ;;  %vm1008_vm2 = vcmp.eq.s32.totalorder %v922_v11, %v3381_v5  ;;  %vm687_vm7 = vcmp.eq.s32.totalorder %v601_v8, %v3381_v5 }
 0x118   : > { %vm1077_vm3 = vmand %vm1009_vm14, %vm3391_vm9  ;;  %2213 = vmatmul.mubr.msk.f32.gmra.mrb[14].mxu1 %vm1074_vm15, %v2688_v47  ;;  %v2068_v20 = vsel %vm688_vm0, 1.0, %v2687_v55 }
 0x119   : > { %v2132_v15 = vsel %vm1077_vm3, 1.0, %v2687_v55  ;;  %vm1076_vm5 = vmand %vm1008_vm2, %vm3391_vm9 }
 0x11a   : > { %v604_v60 = vpop.permute.xlu1 %603  ;;  %v925_v25 = vpop.permute.xlu0 %924  ;;  %2296 = vmatmul.mubr.msk.f32.gmra.mrb[14].mxu0 %vm685_vm1, %v2688_v47  ;;  %2214 = vmatprep.mubr.msk.f32.mxu1 %vm1252_vm13, %v2132_v15 }
 0x11b   : > { %vm1011_vm4 = vcmp.eq.s32.totalorder %v925_v25, %v3388_v30  ;;  %vm690_vm6 = vcmp.eq.s32.totalorder %v604_v60, %v3388_v30  ;;  %2297 = vmatprep.mubr.msk.f32.mxu0 %vm1252_vm13, %v2068_v20  ;;  %vm1010_vm8 = vcmp.eq.s32.totalorder %v925_v25, %v3381_v5  ;;  %vm689_vm15 = vcmp.eq.s32.totalorder %v604_v60, %v3381_v5 }
 0x11c   : > { %vm1079_vm10 = vmand %vm1011_vm4, %vm3391_vm9  ;;  %2215 = vmatmul.mubr.msk.f32.gmra.mrb[16].mxu1 %vm1076_vm5, %v2688_v47  ;;  %v2070_v33 = vsel %vm690_vm6, 1.0, %v2687_v55 }
 0x11d   : > { %v2134_v56 = vsel %vm1079_vm10, 1.0, %v2687_v55  ;;  %vm1078_vm12 = vmand %vm1010_vm8, %vm3391_vm9 }
 0x11e   : > { %v607_v29 = vpop.permute.xlu1 %606  ;;  %v928_v32 = vpop.permute.xlu0 %927  ;;  %2298 = vmatmul.mubr.msk.f32.gmra.mrb[16].mxu0 %vm687_vm7, %v2688_v47  ;;  %2216 = vmatprep.mubr.msk.f32.mxu1 %vm1252_vm13, %v2134_v56 }
 0x11f   : > { %vm1013_vm11 = vcmp.eq.s32.totalorder %v928_v32, %v3388_v30  ;;  %vm692_vm14 = vcmp.eq.s32.totalorder %v607_v29, %v3388_v30  ;;  %2299 = vmatprep.mubr.msk.f32.mxu0 %vm1252_vm13, %v2070_v33  ;;  %vm1012_vm0 = vcmp.eq.s32.totalorder %v928_v32, %v3381_v5  ;;  %vm691_vm5 = vcmp.eq.s32.totalorder %v607_v29, %v3381_v5 }
 0x120   : > { %vm1081_vm1 = vmand %vm1013_vm11, %vm3391_vm9  ;;  %2217 = vmatmul.mubr.msk.f32.gmra.mrb[18].mxu1 %vm1078_vm12, %v2688_v47  ;;  %v2072_v27 = vsel %vm692_vm14, 1.0, %v2687_v55 }
 0x121   : > { %v2136_v18 = vsel %vm1081_vm1, 1.0, %v2687_v55  ;;  %vm1080_vm3 = vmand %vm1012_vm0, %vm3391_vm9 }
 0x122   : > { %v610_v44 = vpop.permute.xlu1 %609  ;;  %v931_v19 = vpop.permute.xlu0 %930  ;;  %2300 = vmatmul.mubr.msk.f32.gmra.mrb[18].mxu0 %vm689_vm15, %v2688_v47  ;;  %2218 = vmatprep.mubr.msk.f32.mxu1 %vm1252_vm13, %v2136_v18 }
 0x123   : > { %vm1015_vm2 = vcmp.eq.s32.totalorder %v931_v19, %v3388_v30  ;;  %vm694_vm4 = vcmp.eq.s32.totalorder %v610_v44, %v3388_v30  ;;  %2301 = vmatprep.mubr.msk.f32.mxu0 %vm1252_vm13, %v2072_v27  ;;  %vm1014_vm6 = vcmp.eq.s32.totalorder %v931_v19, %v3381_v5  ;;  %vm693_vm12 = vcmp.eq.s32.totalorder %v610_v44, %v3381_v5 }
 0x124   : > { %vm1083_vm7 = vmand %vm1015_vm2, %vm3391_vm9  ;;  %2219 = vmatmul.mubr.msk.f32.gmra.mrb[20].mxu1 %vm1080_vm3, %v2688_v47  ;;  %v2074_v14 = vsel %vm694_vm4, 1.0, %v2687_v55 }
 0x125   : > { %v2138_v24 = vsel %vm1083_vm7, 1.0, %v2687_v55  ;;  %vm1082_vm10 = vmand %vm1014_vm6, %vm3391_vm9 }
 0x126   : > { %v613_v13 = vpop.permute.xlu1 %612  ;;  %v934_v35 = vpop.permute.xlu0 %933  ;;  %2302 = vmatmul.mubr.msk.f32.gmra.mrb[20].mxu0 %vm691_vm5, %v2688_v47  ;;  %2220 = vmatprep.mubr.msk.f32.mxu1 %vm1252_vm13, %v2138_v24 }
 0x127   : > { %vm1017_vm8 = vcmp.eq.s32.totalorder %v934_v35, %v3388_v30  ;;  %vm696_vm11 = vcmp.eq.s32.totalorder %v613_v13, %v3388_v30  ;;  %2303 = vmatprep.mubr.msk.f32.mxu0 %vm1252_vm13, %v2074_v14  ;;  %vm1016_vm14 = vcmp.eq.s32.totalorder %v934_v35, %v3381_v5  ;;  %vm695_vm3 = vcmp.eq.s32.totalorder %v613_v13, %v3381_v5 }
 0x128   : > { %vm1085_vm15 = vmand %vm1017_vm8, %vm3391_vm9  ;;  %2221 = vmatmul.mubr.msk.f32.gmra.mrb[22].mxu1 %vm1082_vm10, %v2688_v47  ;;  %v2076_v38 = vsel %vm696_vm11, 1.0, %v2687_v55 }
 0x129   : > { %v2140_v1 = vsel %vm1085_vm15, 1.0, %v2687_v55  ;;  %vm1084_vm1 = vmand %vm1016_vm14, %vm3391_vm9 }
 0x12a   : > { %v616_v54 = vpop.permute.xlu1 %615  ;;  %v937_v0 = vpop.permute.xlu0 %936  ;;  %2304 = vmatmul.mubr.msk.f32.gmra.mrb[22].mxu0 %vm693_vm12, %v2688_v47  ;;  %2222 = vmatprep.mubr.msk.f32.mxu1 %vm1252_vm13, %v2140_v1 }
 0x12b   : > { %vm1019_vm0 = vcmp.eq.s32.totalorder %v937_v0, %v3388_v30  ;;  %vm698_vm2 = vcmp.eq.s32.totalorder %v616_v54, %v3388_v30  ;;  %2305 = vmatprep.mubr.msk.f32.mxu0 %vm1252_vm13, %v2076_v38  ;;  %vm1018_vm4 = vcmp.eq.s32.totalorder %v937_v0, %v3381_v5  ;;  %vm697_vm10 = vcmp.eq.s32.totalorder %v616_v54, %v3381_v5 }
 0x12c   : > { %vm1087_vm5 = vmand %vm1019_vm0, %vm3391_vm9  ;;  %2223 = vmatmul.mubr.msk.f32.gmra.mrb[24].mxu1 %vm1084_vm1, %v2688_v47  ;;  %v2078_v45 = vsel %vm698_vm2, 1.0, %v2687_v55 }
 0x12d   : > { %v2142_v39 = vsel %vm1087_vm5, 1.0, %v2687_v55  ;;  %vm1086_vm7 = vmand %vm1018_vm4, %vm3391_vm9 }
 0x12e   : > { %v619_v2 = vpop.permute.xlu1 %618  ;;  %v940_v34 = vpop.permute.xlu0 %939  ;;  %2306 = vmatmul.mubr.msk.f32.gmra.mrb[24].mxu0 %vm695_vm3, %v2688_v47  ;;  %2224 = vmatprep.mubr.msk.f32.mxu1 %vm1252_vm13, %v2142_v39 }
 0x12f   : > { %vm1021_vm6 = vcmp.eq.s32.totalorder %v940_v34, %v3388_v30  ;;  %vm700_vm8 = vcmp.eq.s32.totalorder %v619_v2, %v3388_v30  ;;  %2307 = vmatprep.mubr.msk.f32.mxu0 %vm1252_vm13, %v2078_v45  ;;  %vm1020_vm11 = vcmp.eq.s32.totalorder %v940_v34, %v3381_v5  ;;  %vm699_vm1 = vcmp.eq.s32.totalorder %v619_v2, %v3381_v5 }
 0x130   : > { %vm1089_vm12 = vmand %vm1021_vm6, %vm3391_vm9  ;;  %2225 = vmatmul.mubr.msk.f32.gmra.mrb[26].mxu1 %vm1086_vm7, %v2688_v47  ;;  %v2080_v4 = vsel %vm700_vm8, 1.0, %v2687_v55 }
 0x131   : > { %v2144_v36 = vsel %vm1089_vm12, 1.0, %v2687_v55  ;;  %vm1088_vm15 = vmand %vm1020_vm11, %vm3391_vm9 }
 0x132   : > { %v622_v31 = vpop.permute.xlu1 %621  ;;  %v943_v37 = vpop.permute.xlu0 %942  ;;  %2308 = vmatmul.mubr.msk.f32.gmra.mrb[26].mxu0 %vm697_vm10, %v2688_v47  ;;  %2226 = vmatprep.mubr.msk.f32.mxu1 %vm1252_vm13, %v2144_v36 }
 0x133   : > { %vm1023_vm14 = vcmp.eq.s32.totalorder %v943_v37, %v3388_v30  ;;  %vm702_vm0 = vcmp.eq.s32.totalorder %v622_v31, %v3388_v30  ;;  %2309 = vmatprep.mubr.msk.f32.mxu0 %vm1252_vm13, %v2080_v4  ;;  %vm1022_vm2 = vcmp.eq.s32.totalorder %v943_v37, %v3381_v5  ;;  %vm701_vm7 = vcmp.eq.s32.totalorder %v622_v31, %v3381_v5 }
 0x134   : > { %vm1091_vm3 = vmand %vm1023_vm14, %vm3391_vm9  ;;  %2227 = vmatmul.mubr.msk.f32.gmra.mrb[28].mxu1 %vm1088_vm15, %v2688_v47  ;;  %v2082_v46 = vsel %vm702_vm0, 1.0, %v2687_v55 }
 0x135   : > { %v2146_v41 = vsel %vm1091_vm3, 1.0, %v2687_v55  ;;  %vm1090_vm5 = vmand %vm1022_vm2, %vm3391_vm9 }
 0x136   : > { %v625_v9 = vpop.permute.xlu1 %624  ;;  %v946_v42 = vpop.permute.xlu0 %945  ;;  %2310 = vmatmul.mubr.msk.f32.gmra.mrb[28].mxu0 %vm699_vm1, %v2688_v47  ;;  %2228 = vmatprep.mubr.msk.f32.mxu1 %vm1252_vm13, %v2146_v41 }
 0x137   : > { %vm1025_vm4 = vcmp.eq.s32.totalorder %v946_v42, %v3388_v30  ;;  %vm704_vm6 = vcmp.eq.s32.totalorder %v625_v9, %v3388_v30  ;;  %2311 = vmatprep.mubr.msk.f32.mxu0 %vm1252_vm13, %v2082_v46  ;;  %vm1024_vm8 = vcmp.eq.s32.totalorder %v946_v42, %v3381_v5  ;;  %vm703_vm15 = vcmp.eq.s32.totalorder %v625_v9, %v3381_v5 }
 0x138   : > { %vm1093_vm10 = vmand %vm1025_vm4, %vm3391_vm9  ;;  %2229 = vmatmul.mubr.msk.f32.gmra.mrb[30].mxu1 %vm1090_vm5, %v2688_v47  ;;  %v2084_v53 = vsel %vm704_vm6, 1.0, %v2687_v55 }
 0x139   : > { %v2148_v49 = vsel %vm1093_vm10, 1.0, %v2687_v55  ;;  %vm1092_vm12 = vmand %vm1024_vm8, %vm3391_vm9 }
 0x13a   : > { %v628_v48 = vpop.permute.xlu1 %627  ;;  %v949_v52 = vpop.permute.xlu0 %948  ;;  %2312 = vmatmul.mubr.msk.f32.gmra.mrb[30].mxu0 %vm701_vm7, %v2688_v47  ;;  %2230 = vmatprep.mubr.msk.f32.mxu1 %vm1252_vm13, %v2148_v49 }
 0x13b   : > { %vm1027_vm11 = vcmp.eq.s32.totalorder %v949_v52, %v3388_v30  ;;  %vm706_vm14 = vcmp.eq.s32.totalorder %v628_v48, %v3388_v30  ;;  %2313 = vmatprep.mubr.msk.f32.mxu0 %vm1252_vm13, %v2084_v53  ;;  %vm1026_vm0 = vcmp.eq.s32.totalorder %v949_v52, %v3381_v5  ;;  %vm705_vm5 = vcmp.eq.s32.totalorder %v628_v48, %v3381_v5 }
 0x13c   : > { %vm1095_vm1 = vmand %vm1027_vm11, %vm3391_vm9  ;;  %2231 = vmatmul.mubr.msk.f32.gmra.mrb[32].mxu1 %vm1092_vm12, %v2688_v47  ;;  %v2086_v63 = vsel %vm706_vm14, 1.0, %v2687_v55 }
 0x13d   : > { %v2150_v59 = vsel %vm1095_vm1, 1.0, %v2687_v55  ;;  %vm1094_vm3 = vmand %vm1026_vm0, %vm3391_vm9 }
 0x13e   : > { %v631_v58 = vpop.permute.xlu1 %630  ;;  %v952_v62 = vpop.permute.xlu0 %951  ;;  %2314 = vmatmul.mubr.msk.f32.gmra.mrb[32].mxu0 %vm703_vm15, %v2688_v47  ;;  %2232 = vmatprep.mubr.msk.f32.mxu1 %vm1252_vm13, %v2150_v59 }
 0x13f   : > { %vm1029_vm2 = vcmp.eq.s32.totalorder %v952_v62, %v3388_v30  ;;  %vm708_vm4 = vcmp.eq.s32.totalorder %v631_v58, %v3388_v30  ;;  %2315 = vmatprep.mubr.msk.f32.mxu0 %vm1252_vm13, %v2086_v63  ;;  %vm1028_vm6 = vcmp.eq.s32.totalorder %v952_v62, %v3381_v5  ;;  %vm707_vm12 = vcmp.eq.s32.totalorder %v631_v58, %v3381_v5 }
 0x140   : > { %vm1097_vm7 = vmand %vm1029_vm2, %vm3391_vm9  ;;  %2233 = vmatmul.mubr.msk.f32.gmra.mrb[34].mxu1 %vm1094_vm3, %v2688_v47  ;;  %v2088_v26 = vsel %vm708_vm4, 1.0, %v2687_v55 }
 0x141   : > { %v2152_v12 = vsel %vm1097_vm7, 1.0, %v2687_v55  ;;  %vm1096_vm10 = vmand %vm1028_vm6, %vm3391_vm9 }
 0x142   : > { %v634_v10 = vpop.permute.xlu1 %633  ;;  %v955_v23 = vpop.permute.xlu0 %954  ;;  %2316 = vmatmul.mubr.msk.f32.gmra.mrb[34].mxu0 %vm705_vm5, %v2688_v47  ;;  %2234 = vmatprep.mubr.msk.f32.mxu1 %vm1252_vm13, %v2152_v12 }
 0x143   : > { %vm1031_vm8 = vcmp.eq.s32.totalorder %v955_v23, %v3388_v30  ;;  %vm710_vm11 = vcmp.eq.s32.totalorder %v634_v10, %v3388_v30  ;;  %2317 = vmatprep.mubr.msk.f32.mxu0 %vm1252_vm13, %v2088_v26  ;;  %vm1030_vm14 = vcmp.eq.s32.totalorder %v955_v23, %v3381_v5  ;;  %vm709_vm3 = vcmp.eq.s32.totalorder %v634_v10, %v3381_v5 }
 0x144   : > { %vm1099_vm15 = vmand %vm1031_vm8, %vm3391_vm9  ;;  %2235 = vmatmul.mubr.msk.f32.gmra.mrb[36].mxu1 %vm1096_vm10, %v2688_v47  ;;  %v2090_v6 = vsel %vm710_vm11, 1.0, %v2687_v55 }
 0x145   : > { %v2154_v51 = vsel %vm1099_vm15, 1.0, %v2687_v55  ;;  %vm1098_vm1 = vmand %vm1030_vm14, %vm3391_vm9 }
 0x146   : > { %v637_v43 = vpop.permute.xlu1 %636  ;;  %v958_v3 = vpop.permute.xlu0 %957  ;;  %2318 = vmatmul.mubr.msk.f32.gmra.mrb[36].mxu0 %vm707_vm12, %v2688_v47  ;;  %2236 = vmatprep.mubr.msk.f32.mxu1 %vm1252_vm13, %v2154_v51 }
 0x147   : > { %vm1033_vm0 = vcmp.eq.s32.totalorder %v958_v3, %v3388_v30  ;;  %vm712_vm2 = vcmp.eq.s32.totalorder %v637_v43, %v3388_v30  ;;  %2319 = vmatprep.mubr.msk.f32.mxu0 %vm1252_vm13, %v2090_v6  ;;  %vm1032_vm4 = vcmp.eq.s32.totalorder %v958_v3, %v3381_v5  ;;  %vm711_vm10 = vcmp.eq.s32.totalorder %v637_v43, %v3381_v5 }
 0x148   : > { %vm1101_vm5 = vmand %vm1033_vm0, %vm3391_vm9  ;;  %2237 = vmatmul.mubr.msk.f32.gmra.mrb[38].mxu1 %vm1098_vm1, %v2688_v47  ;;  %v2092_v21 = vsel %vm712_vm2, 1.0, %v2687_v55 }
 0x149   : > { %v2156_v28 = vsel %vm1101_vm5, 1.0, %v2687_v55  ;;  %vm1100_vm7 = vmand %vm1032_vm4, %vm3391_vm9 }
 0x14a   : > { %v640_v16 = vpop.permute.xlu1 %639  ;;  %v961_v17 = vpop.permute.xlu0 %960  ;;  %2320 = vmatmul.mubr.msk.f32.gmra.mrb[38].mxu0 %vm709_vm3, %v2688_v47  ;;  %2238 = vmatprep.mubr.msk.f32.mxu1 %vm1252_vm13, %v2156_v28 }
 0x14b   : > { %vm1035_vm6 = vcmp.eq.s32.totalorder %v961_v17, %v3388_v30  ;;  %vm714_vm8 = vcmp.eq.s32.totalorder %v640_v16, %v3388_v30  ;;  %2321 = vmatprep.mubr.msk.f32.mxu0 %vm1252_vm13, %v2092_v21  ;;  %vm1034_vm11 = vcmp.eq.s32.totalorder %v961_v17, %v3381_v5  ;;  %vm713_vm1 = vcmp.eq.s32.totalorder %v640_v16, %v3381_v5 }
 0x14c   : > { %vm1103_vm12 = vmand %vm1035_vm6, %vm3391_vm9  ;;  %2239 = vmatmul.mubr.msk.f32.gmra.mrb[40].mxu1 %vm1100_vm7, %v2688_v47  ;;  %v2094_v8 = vsel %vm714_vm8, 1.0, %v2687_v55 }
 0x14d   : > { %v2158_v57 = vsel %vm1103_vm12, 1.0, %v2687_v55  ;;  %vm1102_vm15 = vmand %vm1034_vm11, %vm3391_vm9 }
 0x14e   : > { %v643_v61 = vpop.permute.xlu1 %642  ;;  %v964_v7 = vpop.permute.xlu0 %963  ;;  %2322 = vmatmul.mubr.msk.f32.gmra.mrb[40].mxu0 %vm711_vm10, %v2688_v47  ;;  %2240 = vmatprep.mubr.msk.f32.mxu1 %vm1252_vm13, %v2158_v57 }
 0x14f   : > { %vm1037_vm14 = vcmp.eq.s32.totalorder %v964_v7, %v3388_v30  ;;  %vm716_vm0 = vcmp.eq.s32.totalorder %v643_v61, %v3388_v30  ;;  %2323 = vmatprep.mubr.msk.f32.mxu0 %vm1252_vm13, %v2094_v8  ;;  %vm1036_vm2 = vcmp.eq.s32.totalorder %v964_v7, %v3381_v5  ;;  %vm715_vm7 = vcmp.eq.s32.totalorder %v643_v61, %v3381_v5 }
 0x150   : > { %vm1105_vm3 = vmand %vm1037_vm14, %vm3391_vm9  ;;  %2241 = vmatmul.mubr.msk.f32.gmra.mrb[42].mxu1 %vm1102_vm15, %v2688_v47  ;;  %v2096_v60 = vsel %vm716_vm0, 1.0, %v2687_v55 }
 0x151   : > { %v2160_v11 = vsel %vm1105_vm3, 1.0, %v2687_v55  ;;  %vm1104_vm5 = vmand %vm1036_vm2, %vm3391_vm9 }
 0x152   : > { %v646_v50 = vpop.permute.xlu1 %645  ;;  %v967_v22 = vpop.permute.xlu0 %966  ;;  %2324 = vmatmul.mubr.msk.f32.gmra.mrb[42].mxu0 %vm713_vm1, %v2688_v47  ;;  %2242 = vmatprep.mubr.msk.f32.mxu1 %vm1252_vm13, %v2160_v11 }
 0x153   : > { %vm1039_vm4 = vcmp.eq.s32.totalorder %v967_v22, %v3388_v30  ;;  %vm718_vm6 = vcmp.eq.s32.totalorder %v646_v50, %v3388_v30  ;;  %2325 = vmatprep.mubr.msk.f32.mxu0 %vm1252_vm13, %v2096_v60  ;;  %vm1038_vm8 = vcmp.eq.s32.totalorder %v967_v22, %v3381_v5  ;;  %vm717_vm15 = vcmp.eq.s32.totalorder %v646_v50, %v3381_v5 }
 0x154   : > { %vm1107_vm10 = vmand %vm1039_vm4, %vm3391_vm9  ;;  %2243 = vmatmul.mubr.msk.f32.gmra.mrb[44].mxu1 %vm1104_vm5, %v2688_v47  ;;  %v2098_v29 = vsel %vm718_vm6, 1.0, %v2687_v55 }
 0x155   : > { %v2162_v25 = vsel %vm1107_vm10, 1.0, %v2687_v55  ;;  %vm1106_vm12 = vmand %vm1038_vm8, %vm3391_vm9 }
 0x156   : > { %v649_v15 = vpop.permute.xlu1 %648  ;;  %v970_v20 = vpop.permute.xlu0 %969  ;;  %2326 = vmatmul.mubr.msk.f32.gmra.mrb[44].mxu0 %vm715_vm7, %v2688_v47  ;;  %2244 = vmatprep.mubr.msk.f32.mxu1 %vm1252_vm13, %v2162_v25 }
 0x157   : > { %vm1041_vm11 = vcmp.eq.s32.totalorder %v970_v20, %v3388_v30  ;;  %vm720_vm14 = vcmp.eq.s32.totalorder %v649_v15, %v3388_v30  ;;  %2327 = vmatprep.mubr.msk.f32.mxu0 %vm1252_vm13, %v2098_v29  ;;  %vm1040_vm0 = vcmp.eq.s32.totalorder %v970_v20, %v3381_v5  ;;  %vm719_vm5 = vcmp.eq.s32.totalorder %v649_v15, %v3381_v5 }
 0x158   : > { %vm1109_vm1 = vmand %vm1041_vm11, %vm3391_vm9  ;;  %2245 = vmatmul.mubr.msk.f32.gmra.mrb[46].mxu1 %vm1106_vm12, %v2688_v47  ;;  %v2100_v44 = vsel %vm720_vm14, 1.0, %v2687_v55 }
 0x159   : > { %v2164_v32 = vsel %vm1109_vm1, 1.0, %v2687_v55  ;;  %vm1108_vm3 = vmand %vm1040_vm0, %vm3391_vm9 }
 0x15a   : > { %v652_v56 = vpop.permute.xlu1 %651  ;;  %v973_v33 = vpop.permute.xlu0 %972  ;;  %2328 = vmatmul.mubr.msk.f32.gmra.mrb[46].mxu0 %vm717_vm15, %v2688_v47  ;;  %2246 = vmatprep.mubr.msk.f32.mxu1 %vm1252_vm13, %v2164_v32 }
 0x15b   : > { %vm1043_vm2 = vcmp.eq.s32.totalorder %v973_v33, %v3388_v30  ;;  %vm722_vm4 = vcmp.eq.s32.totalorder %v652_v56, %v3388_v30  ;;  %2329 = vmatprep.mubr.msk.f32.mxu0 %vm1252_vm13, %v2100_v44  ;;  %vm1042_vm6 = vcmp.eq.s32.totalorder %v973_v33, %v3381_v5  ;;  %vm721_vm12 = vcmp.eq.s32.totalorder %v652_v56, %v3381_v5 }
 0x15c   : > { %vm1111_vm7 = vmand %vm1043_vm2, %vm3391_vm9  ;;  %2247 = vmatmul.mubr.msk.f32.gmra.mrb[48].mxu1 %vm1108_vm3, %v2688_v47  ;;  %v2102_v13 = vsel %vm722_vm4, 1.0, %v2687_v55 }
 0x15d   : > { %v2166_v19 = vsel %vm1111_vm7, 1.0, %v2687_v55  ;;  %vm1110_vm10 = vmand %vm1042_vm6, %vm3391_vm9 }
 0x15e   : > { %v655_v18 = vpop.permute.xlu1 %654  ;;  %v976_v27 = vpop.permute.xlu0 %975  ;;  %2330 = vmatmul.mubr.msk.f32.gmra.mrb[48].mxu0 %vm719_vm5, %v2688_v47  ;;  %2248 = vmatprep.mubr.msk.f32.mxu1 %vm1252_vm13, %v2166_v19 }
 0x15f   : > { %vm1045_vm8 = vcmp.eq.s32.totalorder %v976_v27, %v3388_v30  ;;  %vm724_vm11 = vcmp.eq.s32.totalorder %v655_v18, %v3388_v30  ;;  %2331 = vmatprep.mubr.msk.f32.mxu0 %vm1252_vm13, %v2102_v13  ;;  %vm1044_vm14 = vcmp.eq.s32.totalorder %v976_v27, %v3381_v5  ;;  %vm723_vm3 = vcmp.eq.s32.totalorder %v655_v18, %v3381_v5 }
 0x160   : > { %vm1113_vm15 = vmand %vm1045_vm8, %vm3391_vm9  ;;  %2249 = vmatmul.mubr.msk.f32.gmra.mrb[50].mxu1 %vm1110_vm10, %v2688_v47  ;;  %v2104_v54 = vsel %vm724_vm11, 1.0, %v2687_v55 }
 0x161   : > { %v2168_v35 = vsel %vm1113_vm15, 1.0, %v2687_v55  ;;  %vm1112_vm1 = vmand %vm1044_vm14, %vm3391_vm9 }
 0x162   : > { %v658_v24 = vpop.permute.xlu1 %657  ;;  %v979_v14 = vpop.permute.xlu0 %978  ;;  %2332 = vmatmul.mubr.msk.f32.gmra.mrb[50].mxu0 %vm721_vm12, %v2688_v47  ;;  %2250 = vmatprep.mubr.msk.f32.mxu1 %vm1252_vm13, %v2168_v35 }
 0x163   : > { %vm1047_vm0 = vcmp.eq.s32.totalorder %v979_v14, %v3388_v30  ;;  %vm726_vm2 = vcmp.eq.s32.totalorder %v658_v24, %v3388_v30  ;;  %2333 = vmatprep.mubr.msk.f32.mxu0 %vm1252_vm13, %v2104_v54  ;;  %vm1046_vm4 = vcmp.eq.s32.totalorder %v979_v14, %v3381_v5  ;;  %vm725_vm10 = vcmp.eq.s32.totalorder %v658_v24, %v3381_v5 }
 0x164   : > { %vm1115_vm5 = vmand %vm1047_vm0, %vm3391_vm9  ;;  %2251 = vmatmul.mubr.msk.f32.gmra.mrb[52].mxu1 %vm1112_vm1, %v2688_v47  ;;  %v2106_v2 = vsel %vm726_vm2, 1.0, %v2687_v55 }
 0x165   : > { %v2170_v0 = vsel %vm1115_vm5, 1.0, %v2687_v55  ;;  %vm1114_vm7 = vmand %vm1046_vm4, %vm3391_vm9 }
 0x166   : > { %v661_v1 = vpop.permute.xlu1 %660  ;;  %v982_v38 = vpop.permute.xlu0 %981  ;;  %2334 = vmatmul.mubr.msk.f32.gmra.mrb[52].mxu0 %vm723_vm3, %v2688_v47  ;;  %2252 = vmatprep.mubr.msk.f32.mxu1 %vm1252_vm13, %v2170_v0 }
 0x167   : > { %vm1049_vm6 = vcmp.eq.s32.totalorder %v982_v38, %v3388_v30  ;;  %vm728_vm8 = vcmp.eq.s32.totalorder %v661_v1, %v3388_v30  ;;  %2335 = vmatprep.mubr.msk.f32.mxu0 %vm1252_vm13, %v2106_v2  ;;  %vm1048_vm11 = vcmp.eq.s32.totalorder %v982_v38, %v3381_v5  ;;  %vm727_vm1 = vcmp.eq.s32.totalorder %v661_v1, %v3381_v5 }
 0x168   : > { %vm1117_vm12 = vmand %vm1049_vm6, %vm3391_vm9  ;;  %2253 = vmatmul.mubr.msk.f32.gmra.mrb[54].mxu1 %vm1114_vm7, %v2688_v47  ;;  %v2108_v31 = vsel %vm728_vm8, 1.0, %v2687_v55 }
 0x169   : > { %v2172_v34 = vsel %vm1117_vm12, 1.0, %v2687_v55  ;;  %vm1116_vm15 = vmand %vm1048_vm11, %vm3391_vm9 }
 0x16a   : > { %v664_v39 = vpop.permute.xlu1 %663  ;;  %v985_v45 = vpop.permute.xlu0 %984  ;;  %2336 = vmatmul.mubr.msk.f32.gmra.mrb[54].mxu0 %vm725_vm10, %v2688_v47  ;;  %2254 = vmatprep.mubr.msk.f32.mxu1 %vm1252_vm13, %v2172_v34 }
 0x16b   : > { %vm1051_vm14 = vcmp.eq.s32.totalorder %v985_v45, %v3388_v30  ;;  %vm730_vm0 = vcmp.eq.s32.totalorder %v664_v39, %v3388_v30  ;;  %2337 = vmatprep.mubr.msk.f32.mxu0 %vm1252_vm13, %v2108_v31  ;;  %vm1050_vm2 = vcmp.eq.s32.totalorder %v985_v45, %v3381_v5  ;;  %vm729_vm7 = vcmp.eq.s32.totalorder %v664_v39, %v3381_v5 }
 0x16c   : > { %vm1119_vm3 = vmand %vm1051_vm14, %vm3391_vm9  ;;  %2255 = vmatmul.mubr.msk.f32.gmra.mrb[56].mxu1 %vm1116_vm15, %v2688_v47  ;;  %v2110_v9 = vsel %vm730_vm0, 1.0, %v2687_v55 }
 0x16d   : > { %v2174_v37 = vsel %vm1119_vm3, 1.0, %v2687_v55  ;;  %vm1118_vm5 = vmand %vm1050_vm2, %vm3391_vm9 }
 0x16e   : > { %v667_v36 = vpop.permute.xlu1 %666  ;;  %v988_v4 = vpop.permute.xlu0 %987  ;;  %2338 = vmatmul.mubr.msk.f32.gmra.mrb[56].mxu0 %vm727_vm1, %v2688_v47  ;;  %2256 = vmatprep.mubr.msk.f32.mxu1 %vm1252_vm13, %v2174_v37 }
 0x16f   : > { %vm1053_vm4 = vcmp.eq.s32.totalorder %v988_v4, %v3388_v30  ;;  %vm732_vm6 = vcmp.eq.s32.totalorder %v667_v36, %v3388_v30  ;;  %2339 = vmatprep.mubr.msk.f32.mxu0 %vm1252_vm13, %v2110_v9  ;;  %vm1052_vm8 = vcmp.eq.s32.totalorder %v988_v4, %v3381_v5  ;;  %vm731_vm15 = vcmp.eq.s32.totalorder %v667_v36, %v3381_v5 }
 0x170   : > { %vm1121_vm10 = vmand %vm1053_vm4, %vm3391_vm9  ;;  %2257 = vmatmul.mubr.msk.f32.gmra.mrb[58].mxu1 %vm1118_vm5, %v2688_v47  ;;  %v2112_v48 = vsel %vm732_vm6, 1.0, %v2687_v55 }
 0x171   : > { %v2176_v42 = vsel %vm1121_vm10, 1.0, %v2687_v55  ;;  %vm1120_vm14 = vmand %vm1052_vm8, %vm3391_vm9 }
 0x172   : > { %v670_v41 = vpop.permute.xlu1 %669  ;;  %v991_v46 = vpop.permute.xlu0 %990  ;;  %2340 = vmatmul.mubr.msk.f32.gmra.mrb[58].mxu0 %vm729_vm7, %v2688_v47  ;;  %2258 = vmatprep.mubr.msk.f32.mxu1 %vm1252_vm13, %v2176_v42 }
 0x173   : > { %vm734_vm11 = vcmp.eq.s32.totalorder %v670_v41, %v3388_v30  ;;  %vm1055_vm12 = vcmp.eq.s32.totalorder %v991_v46, %v3388_v30  ;;  %2341 = vmatprep.mubr.msk.f32.mxu0 %vm1252_vm13, %v2112_v48  ;;  %vm1054_vm1 = vcmp.eq.s32.totalorder %v991_v46, %v3381_v5  ;;  %vm733_vm2 = vcmp.eq.s32.totalorder %v670_v41, %v3381_v5 }
 0x174   : > { %vm1123_vm0 = vmand %vm1055_vm12, %vm3391_vm9  ;;  %v2114_v49 = vsel %vm734_vm11, 1.0, %v2687_v55  ;;  %2259 = vmatmul.mubr.msk.f32.gmra.mrb[60].mxu1 %vm1120_vm14, %v2688_v47 }
 0x175   : > { %v2178_v52 = vsel %vm1123_vm0, 1.0, %v2687_v55  ;;  %vm1122_vm3 = vmand %vm1054_vm1, %vm3391_vm9 }
 0x176   : > { %2342 = vmatmul.mubr.msk.f32.gmra.mrb[60].mxu0 %vm731_vm15, %v2688_v47  ;;  %2260 = vmatprep.mubr.msk.f32.mxu1 %vm1252_vm13, %v2178_v52 }
 0x177   : > { %2343 = vmatprep.mubr.msk.f32.mxu0 %vm1252_vm13, %v2114_v49 }
 0x178   : > { %2261 = vmatmul.mubr.msk.f32.gmra.mrb[62].mxu1 %vm1122_vm3, %v2688_v47 }
 0x17a   : > { %2344 = vmatmul.mubr.msk.f32.gmra.mrb[62].mxu0 %vm733_vm2, %v2688_v47 }
 0x1cf   : > { %v1415_v55 = vpop.f32.mrb[0].mxu1 }
 0x1d0   : > { %v1417_v53 = vpop.f32.mrb[1].mxu1 }
 0x1d1   : > { %v1736_v30 = vpop.f32.mrb[0].mxu0 }
 0x1d2   : > { %v1737_v58 = vadd.f32 %v1736_v30, %v1415_v55  ;;  %v1738_v59 = vpop.f32.mrb[1].mxu0 }
 0x1d3   : > { %v1420_v5 = vpop.f32.mrb[2].mxu1 }
 0x1d4   : > { %1895 = vst [vmem:[%s3845_s13] sm:$0xff] %v1737_v58  ;;  %v1422_v62 = vpop.f32.mrb[3].mxu1 }
 0x1d5   : > { %v1741_v40 = vpop.f32.mrb[2].mxu0 }
 0x1d6   : > { %v1742_v63 = vadd.f32 %v1741_v40, %v1420_v5  ;;  %v1743_v47 = vpop.f32.mrb[3].mxu0 }
 0x1d7   : > { %v1425_v10 = vpop.f32.mrb[4].mxu1 }
 0x1d8   : > { %1896 = vst [vmem:[%s3845_s13 + $0x8] sm:$0xff] %v1742_v63  ;;  %v1427_v23 = vpop.f32.mrb[5].mxu1 }
 0x1d9   : > { %v1746_v12 = vpop.f32.mrb[4].mxu0 }
 0x1da   : > { %v1747_v26 = vadd.f32 %v1746_v12, %v1425_v10  ;;  %v1748_v43 = vpop.f32.mrb[5].mxu0 }
 0x1db   : > { %v1430_v51 = vpop.f32.mrb[6].mxu1 }
 0x1dc   : > { %1897 = vst [vmem:[%s3845_s13 + $0x10] sm:$0xff] %v1747_v26  ;;  %v1432_v6 = vpop.f32.mrb[7].mxu1 }
 0x1dd   : > { %v1751_v3 = vpop.f32.mrb[6].mxu0 }
 0x1de   : > { %v1752_v16 = vadd.f32 %v1751_v3, %v1430_v51  ;;  %v1753_v28 = vpop.f32.mrb[7].mxu0 }
 0x1df   : > { %v1435_v17 = vpop.f32.mrb[8].mxu1 }
 0x1e0   : > { %1898 = vst [vmem:[%s3845_s13 + $0x18] sm:$0xff] %v1752_v16  ;;  %v1437_v61 = vpop.f32.mrb[9].mxu1 }
 0x1e1   : > { %v1756_v21 = vpop.f32.mrb[8].mxu0 }
 0x1e2   : > { %v1757_v57 = vadd.f32 %v1756_v21, %v1435_v17  ;;  %v1758_v7 = vpop.f32.mrb[9].mxu0 }
 0x1e3   : > { %v1440_v8 = vpop.f32.mrb[10].mxu1 }
 0x1e4   : > { %1899 = vst [vmem:[%s3845_s13 + $0x20] sm:$0xff] %v1757_v57  ;;  %v1442_v11 = vpop.f32.mrb[11].mxu1 }
 0x1e5   : > { %v1761_v50 = vpop.f32.mrb[10].mxu0 }
 0x1e6   : > { %v1762_v22 = vadd.f32 %v1761_v50, %v1440_v8  ;;  %v1763_v60 = vpop.f32.mrb[11].mxu0 }
 0x1e7   : > { %v1445_v15 = vpop.f32.mrb[12].mxu1 }
 0x1e8   : > { %1900 = vst [vmem:[%s3845_s13 + $0x28] sm:$0xff] %v1762_v22  ;;  %v1447_v20 = vpop.f32.mrb[13].mxu1 }
 0x1e9   : > { %v1766_v25 = vpop.f32.mrb[12].mxu0 }
 0x1ea   : > { %v1767_v29 = vadd.f32 %v1766_v25, %v1445_v15  ;;  %v1768_v56 = vpop.f32.mrb[13].mxu0 }
 0x1eb   : > { %v1450_v32 = vpop.f32.mrb[14].mxu1 }
 0x1ec   : > { %1901 = vst [vmem:[%s3845_s13 + $0x30] sm:$0xff] %v1767_v29  ;;  %v1452_v44 = vpop.f32.mrb[15].mxu1 }
 0x1ed   : > { %v1771_v33 = vpop.f32.mrb[14].mxu0 }
 0x1ee   : > { %v1772_v18 = vadd.f32 %v1771_v33, %v1450_v32  ;;  %v1773_v19 = vpop.f32.mrb[15].mxu0 }
 0x1ef   : > { %v1455_v27 = vpop.f32.mrb[16].mxu1 }
 0x1f0   : > { %1902 = vst [vmem:[%s3845_s13 + $0x38] sm:$0xff] %v1772_v18  ;;  %v1457_v24 = vpop.f32.mrb[17].mxu1 }
 0x1f1   : > { %v1776_v13 = vpop.f32.mrb[16].mxu0 }
 0x1f2   : > { %v1777_v35 = vadd.f32 %v1776_v13, %v1455_v27  ;;  %v1778_v14 = vpop.f32.mrb[17].mxu0 }
 0x1f3   : > { %v1460_v54 = vpop.f32.mrb[18].mxu1 }
 0x1f4   : > { %1903 = vst [vmem:[%s3845_s13 + $0x40] sm:$0xff] %v1777_v35  ;;  %v1462_v0 = vpop.f32.mrb[19].mxu1 }
 0x1f5   : > { %v1781_v1 = vpop.f32.mrb[18].mxu0 }
 0x1f6   : > { %v1782_v38 = vadd.f32 %v1781_v1, %v1460_v54  ;;  %v1783_v2 = vpop.f32.mrb[19].mxu0 }
 0x1f7   : > { %v1465_v39 = vpop.f32.mrb[20].mxu1 }
 0x1f8   : > { %1904 = vst [vmem:[%s3845_s13 + $0x48] sm:$0xff] %v1782_v38  ;;  %v1467_v45 = vpop.f32.mrb[21].mxu1 }
 0x1f9   : > { %v1786_v34 = vpop.f32.mrb[20].mxu0 }
 0x1fa   : > { %v1787_v31 = vadd.f32 %v1786_v34, %v1465_v39  ;;  %v1788_v36 = vpop.f32.mrb[21].mxu0 }
 0x1fb   : > { %v1470_v37 = vpop.f32.mrb[22].mxu1 }
 0x1fc   : > { %1905 = vst [vmem:[%s3845_s13 + $0x50] sm:$0xff] %v1787_v31  ;;  %v1472_v9 = vpop.f32.mrb[23].mxu1 }
 0x1fd   : > { %v1791_v4 = vpop.f32.mrb[22].mxu0 }
 0x1fe   : > { %v1792_v41 = vadd.f32 %v1791_v4, %v1470_v37  ;;  %v1793_v42 = vpop.f32.mrb[23].mxu0 }
 0x1ff   : > { %v1475_v46 = vpop.f32.mrb[24].mxu1 }
 0x200   : > { %1906 = vst [vmem:[%s3845_s13 + $0x58] sm:$0xff] %v1792_v41  ;;  %v1477_v49 = vpop.f32.mrb[25].mxu1 }
 0x201   : > { %v1796_v48 = vpop.f32.mrb[24].mxu0 }
 0x202   : > { %v1797_v52 = vadd.f32 %v1796_v48, %v1475_v46  ;;  %v1798_v55 = vpop.f32.mrb[25].mxu0 }
 0x203   : > { %v1480_v30 = vpop.f32.mrb[26].mxu1 }
 0x204   : > { %1907 = vst [vmem:[%s3845_s13 + $0x60] sm:$0xff] %v1797_v52  ;;  %v1482_v58 = vpop.f32.mrb[27].mxu1 }
 0x205   : > { %v1801_v53 = vpop.f32.mrb[26].mxu0 }
 0x206   : > { %v1802_v59 = vadd.f32 %v1801_v53, %v1480_v30  ;;  %v1803_v5 = vpop.f32.mrb[27].mxu0 }
 0x207   : > { %v1485_v40 = vpop.f32.mrb[28].mxu1 }
 0x208   : > { %1908 = vst [vmem:[%s3845_s13 + $0x68] sm:$0xff] %v1802_v59  ;;  %v1487_v63 = vpop.f32.mrb[29].mxu1 }
 0x209   : > { %v1806_v62 = vpop.f32.mrb[28].mxu0 }
 0x20a   : > { %v1807_v47 = vadd.f32 %v1806_v62, %v1485_v40  ;;  %v1808_v10 = vpop.f32.mrb[29].mxu0 }
 0x20b   : > { %v1490_v12 = vpop.f32.mrb[30].mxu1 }
 0x20c   : > { %1909 = vst [vmem:[%s3845_s13 + $0x70] sm:$0xff] %v1807_v47  ;;  %v1492_v26 = vpop.f32.mrb[31].mxu1 }
 0x20d   : > { %v1811_v23 = vpop.f32.mrb[30].mxu0 }
 0x20e   : > { %v1812_v43 = vadd.f32 %v1811_v23, %v1490_v12  ;;  %v1813_v51 = vpop.f32.mrb[31].mxu0 }
 0x20f   : > { %v1495_v3 = vpop.f32.mrb[32].mxu1 }
 0x210   : > { %1910 = vst [vmem:[%s3845_s13 + $0x78] sm:$0xff] %v1812_v43  ;;  %v1497_v16 = vpop.f32.mrb[33].mxu1 }
 0x211   : > { %v1816_v6 = vpop.f32.mrb[32].mxu0 }
 0x212   : > { %v1817_v28 = vadd.f32 %v1816_v6, %v1495_v3  ;;  %v1818_v17 = vpop.f32.mrb[33].mxu0 }
 0x213   : > { %v1500_v21 = vpop.f32.mrb[34].mxu1 }
 0x214   : > { %1911 = vst [vmem:[%s3845_s13 + $0x80] sm:$0xff] %v1817_v28  ;;  %v1502_v57 = vpop.f32.mrb[35].mxu1 }
 0x215   : > { %v1821_v61 = vpop.f32.mrb[34].mxu0 }
 0x216   : > { %v1822_v7 = vadd.f32 %v1821_v61, %v1500_v21  ;;  %v1823_v8 = vpop.f32.mrb[35].mxu0 }
 0x217   : > { %v1505_v50 = vpop.f32.mrb[36].mxu1 }
 0x218   : > { %1912 = vst [vmem:[%s3845_s13 + $0x88] sm:$0xff] %v1822_v7  ;;  %v1507_v22 = vpop.f32.mrb[37].mxu1 }
 0x219   : > { %v1826_v11 = vpop.f32.mrb[36].mxu0 }
 0x21a   : > { %v1827_v60 = vadd.f32 %v1826_v11, %v1505_v50  ;;  %v1828_v15 = vpop.f32.mrb[37].mxu0 }
 0x21b   : > { %v1510_v25 = vpop.f32.mrb[38].mxu1 }
 0x21c   : > { %1913 = vst [vmem:[%s3845_s13 + $0x90] sm:$0xff] %v1827_v60  ;;  %v1512_v29 = vpop.f32.mrb[39].mxu1 }
 0x21d   : > { %v1831_v20 = vpop.f32.mrb[38].mxu0 }
 0x21e   : > { %v1832_v56 = vadd.f32 %v1831_v20, %v1510_v25  ;;  %v1833_v32 = vpop.f32.mrb[39].mxu0 }
 0x21f   : > { %v1515_v33 = vpop.f32.mrb[40].mxu1 }
 0x220   : > { %1914 = vst [vmem:[%s3845_s13 + $0x98] sm:$0xff] %v1832_v56  ;;  %v1517_v18 = vpop.f32.mrb[41].mxu1 }
 0x221   : > { %v1836_v44 = vpop.f32.mrb[40].mxu0 }
 0x222   : > { %v1837_v19 = vadd.f32 %v1836_v44, %v1515_v33  ;;  %v1838_v27 = vpop.f32.mrb[41].mxu0 }
 0x223   : > { %v1520_v13 = vpop.f32.mrb[42].mxu1 }
 0x224   : > { %1915 = vst [vmem:[%s3845_s13 + $0xa0] sm:$0xff] %v1837_v19  ;;  %v1522_v35 = vpop.f32.mrb[43].mxu1 }
 0x225   : > { %v1841_v24 = vpop.f32.mrb[42].mxu0 }
 0x226   : > { %v1842_v14 = vadd.f32 %v1841_v24, %v1520_v13  ;;  %v1843_v54 = vpop.f32.mrb[43].mxu0 }
 0x227   : > { %v1525_v1 = vpop.f32.mrb[44].mxu1 }
 0x228   : > { %1916 = vst [vmem:[%s3845_s13 + $0xa8] sm:$0xff] %v1842_v14  ;;  %v1527_v38 = vpop.f32.mrb[45].mxu1 }
 0x229   : > { %v1846_v0 = vpop.f32.mrb[44].mxu0 }
 0x22a   : > { %v1847_v2 = vadd.f32 %v1846_v0, %v1525_v1  ;;  %v1848_v39 = vpop.f32.mrb[45].mxu0 }
 0x22b   : > { %v1530_v34 = vpop.f32.mrb[46].mxu1 }
 0x22c   : > { %1917 = vst [vmem:[%s3845_s13 + $0xb0] sm:$0xff] %v1847_v2  ;;  %v1532_v31 = vpop.f32.mrb[47].mxu1 }
 0x22d   : > { %v1851_v45 = vpop.f32.mrb[46].mxu0 }
 0x22e   : > { %v1852_v36 = vadd.f32 %v1851_v45, %v1530_v34  ;;  %v1853_v37 = vpop.f32.mrb[47].mxu0 }
 0x22f   : > { %v1535_v4 = vpop.f32.mrb[48].mxu1 }
 0x230   : > { %1918 = vst [vmem:[%s3845_s13 + $0xb8] sm:$0xff] %v1852_v36  ;;  %v1537_v41 = vpop.f32.mrb[49].mxu1 }
 0x231   : > { %v1856_v9 = vpop.f32.mrb[48].mxu0 }
 0x232   : > { %v1857_v42 = vadd.f32 %v1856_v9, %v1535_v4  ;;  %v1858_v46 = vpop.f32.mrb[49].mxu0 }
 0x233   : > { %v1540_v48 = vpop.f32.mrb[50].mxu1 }
 0x234   : > { %1919 = vst [vmem:[%s3845_s13 + $0xc0] sm:$0xff] %v1857_v42  ;;  %v1542_v52 = vpop.f32.mrb[51].mxu1 }
 0x235   : > { %v1861_v49 = vpop.f32.mrb[50].mxu0 }
 0x236   : > { %v1862_v55 = vadd.f32 %v1861_v49, %v1540_v48  ;;  %v1863_v30 = vpop.f32.mrb[51].mxu0 }
 0x237   : > { %v1545_v53 = vpop.f32.mrb[52].mxu1 }
 0x238   : > { %1920 = vst [vmem:[%s3845_s13 + $0xc8] sm:$0xff] %v1862_v55  ;;  %v1547_v59 = vpop.f32.mrb[53].mxu1 }
 0x239   : > { %v1866_v58 = vpop.f32.mrb[52].mxu0 }
 0x23a   : > { %v1867_v5 = vadd.f32 %v1866_v58, %v1545_v53  ;;  %v1868_v40 = vpop.f32.mrb[53].mxu0 }
 0x23b   : > { %v1550_v62 = vpop.f32.mrb[54].mxu1 }
 0x23c   : > { %1921 = vst [vmem:[%s3845_s13 + $0xd0] sm:$0xff] %v1867_v5  ;;  %v1552_v47 = vpop.f32.mrb[55].mxu1 }
 0x23d   : > { %v1871_v63 = vpop.f32.mrb[54].mxu0 }
 0x23e   : > { %v1872_v10 = vadd.f32 %v1871_v63, %v1550_v62  ;;  %v1873_v12 = vpop.f32.mrb[55].mxu0 }
 0x23f   : > { %v1555_v23 = vpop.f32.mrb[56].mxu1 }
 0x240   : > { %1922 = vst [vmem:[%s3845_s13 + $0xd8] sm:$0xff] %v1872_v10  ;;  %v1557_v43 = vpop.f32.mrb[57].mxu1 }
 0x241   : > { %v1876_v26 = vpop.f32.mrb[56].mxu0 }
 0x242   : > { %v1877_v51 = vadd.f32 %v1876_v26, %v1555_v23  ;;  %v1878_v3 = vpop.f32.mrb[57].mxu0 }
 0x243   : > { %v1560_v6 = vpop.f32.mrb[58].mxu1 }
 0x244   : > { %1923 = vst [vmem:[%s3845_s13 + $0xe0] sm:$0xff] %v1877_v51  ;;  %v1562_v28 = vpop.f32.mrb[59].mxu1 }
 0x245   : > { %v1881_v16 = vpop.f32.mrb[58].mxu0 }
 0x246   : > { %v1882_v17 = vadd.f32 %v1881_v16, %v1560_v6  ;;  %v1883_v21 = vpop.f32.mrb[59].mxu0 }
 0x247   : > { %v1565_v61 = vpop.f32.mrb[60].mxu1 }
 0x248   : > { %1924 = vst [vmem:[%s3845_s13 + $0xe8] sm:$0xff] %v1882_v17  ;;  %v1567_v7 = vpop.f32.mrb[61].mxu1 }
 0x249   : > { %v1886_v57 = vpop.f32.mrb[60].mxu0 }
 0x24a   : > { %v1887_v8 = vadd.f32 %v1886_v57, %v1565_v61  ;;  %v1888_v50 = vpop.f32.mrb[61].mxu0 }
 0x24b   : > { %v1570_v11 = vpop.f32.mrb[62].mxu1 }
 0x24c   : > { %1925 = vst [vmem:[%s3845_s13 + $0xf0] sm:$0xff] %v1887_v8  ;;  %v1572_v60 = vpop.f32.mrb[63].mxu1 }
 0x24d   : > { %v1891_v22 = vpop.f32.mrb[62].mxu0 }
 0x24e   : > { %v1892_v15 = vadd.f32 %v1891_v22, %v1570_v11  ;;  %v1893_v25 = vpop.f32.mrb[63].mxu0 }
 0x250   : > { %1926 = vst [vmem:[%s3845_s13 + $0xf8] sm:$0xff] %v1892_v15 }
 0x251   : > { %2599 = shalt.err (!%p2596_p5)
}
 0x252   : > { %s2600_s14 = scalar_lea.hbm %s3883_s26, 4096  ;;  %s2604_s18 = scalar_lea.hbm %s3944_s5, 12288 }
 0x253   : > { %p2601_p2 = scmp.ne.s32.totalorder %s3883_s26, %s2600_s14  ;;  %p2605_p9 = scmp.lt.u32.totalorder %s3883_s26, %s3944_s5 }
 0x254   : > { %p2606_p1 = scmp.lt.u32.totalorder %s2604_s18, %s2600_s14  ;;  %p2608_p10 = scmp.lt.u32.totalorder %s2600_s14, %s3883_s26 }
 0x255   : > { %p2602_p6 = pnand %p2601_p2, %p2798_p7 }
 0x256   : > { %p2607_p12 = por %p2606_p1, %p2605_p9 }
 0x257   : > { %p2603_p8 = pneg %p2602_p6 }
 0x258   : > { %p2609_p11 = por %p2608_p10, %p2607_p12 }
 0x25a   : > { %p2610_p13 = pnand %p2609_p11, %p2603_p8 }
 0x25c   : > { %2613 = shalt.err (!%p2610_p13)
}
 0x25d   : > { %s2690_s15 = smov 128   ;;  %s2691_s23 = smov 8  }
 0x25e   : > { %2459 = dma.vmem_to_hbm [thread:$0]  (%p2798_p7), %s3885_s17, 4096, %s3883_s26, %s3890_s8, %s2690_s15, %s2690_s15, %s2691_s23  }
 0x25f PF: > { %p2465_p0 = scmp.ge.s32.totalorder %s2678_s7, 2  ;;  %s1956_s25 = sand.u32 1, %s2654_s1  }
 0x260   : > { %p3974_p3 = scmp.ne.s32.totalorder %s3949_s22, 0  ;;  %s1957_s24 = scalar_lea.sflag [#allocation7], %s1956_s25 }
 0x262   : > { %p2462_p4 = pnand %p2465_p0, %p3974_p3 }
 0x264   : > { %2649 = dma.done.wait (!%p2462_p4), %s1957_s24, 4096  }
 0x265   : > { %2651 = vsyncadd (!%p2462_p4), %s1957_s24, 4294963200  ;;  %p28_p7 = scmp.ge.s32.totalorder %s2766_s10, 5   ;;  %s3975_s1 = smov %s2658_s27 }
 0x266   : > { %s3976_s27 = smov %s2662_s28  ;;  %s3977_s28 = smov %s2793_s19 }
 0x267   : > { %s3978_s29 = smov %s2670_s30  ;;  %s3979_s30 = smov %s2674_s6 }
 0x268   : > { %s3980_s6 = smov %s2796_s20  ;;  %s3981_s7 = smov %s2766_s10 }
 0x269   :  { %30 = sbr.rel (!%p28_p7) target bundleno = 32 (0x20), region = 83 }
 0x270   :  { %1962 = vsyncpa [#allocation6], 1 }
 0x271   :  { %1964 = vsyncpa [#allocation6 + $0x1], 1 }
 0x272   :  { %1965 = vsyncpa [#allocation7], 1 }
 0x273   :  { %1967 = vsyncpa [#allocation7 + $0x1], 1 }

</bundles_post_ra>
